<compile_context>
chip_gen: v6e
topology: v6e:2x2x1
jax: 0.10.0
libtpu: 0.0.40
codegen_flags: <defaults>
</compile_context>

<pallas_src>
import functools

import jax
import jax.numpy as jnp
import numpy as np
from jax.experimental import pallas as pl
from jax.experimental.pallas import tpu as pltpu

EPS = 1e-6
NUM_GROUPS = 32
# Above this Cin the im2col is built 3 taps (one ky row) at a time: the col
# scratch shrinks 3x while K = 3*Cin still saturates the MXU contraction depth.
_NINE_TAP_MAX_CIN = 256


# --------------------------------------------------------------------------
# compiler params / VMEM budget (generation dependent)
# --------------------------------------------------------------------------
@functools.lru_cache(maxsize=None)
def _vmem_limit():
    # ~3/4 of physical VMEM: 48 MiB on v7x (64 MiB), 96 MiB on v5e/v6e (128 MiB).
    try:
        info = pltpu.get_tpu_info()
        for name in ("vmem_capacity_bytes", "vmem_size_bytes", "vmem_bytes"):
            cap = getattr(info, name, None)
            if cap:
                return int(min(cap * 3 // 4, 112 * 1024 * 1024))
    except Exception:
        pass
    return 48 * 1024 * 1024


@functools.lru_cache(maxsize=None)
def _cparams():
    return pltpu.CompilerParams(dimension_semantics=("parallel",),
                                vmem_limit_bytes=_vmem_limit())


# --------------------------------------------------------------------------
# BlockSpec helpers: grid-invariant operands are single-buffered (Buffered(1))
# so large conv/attn weights do not burn a redundant second VMEM buffer.
# A tiny probe kernel checks once that Buffered(1) lowers on this jax/libtpu;
# otherwise we fall back to default buffering (correct either way).
# --------------------------------------------------------------------------
def _sb_probe_kernel(x_ref, o_ref):
    o_ref[...] = x_ref[...]


@functools.lru_cache(maxsize=None)
def _single_buffer_ok():
    try:
        fn = pl.pallas_call(
            _sb_probe_kernel,
            out_shape=jax.ShapeDtypeStruct((8, 128), jnp.float32),
            grid=(1,),
            in_specs=[pl.BlockSpec((8, 128), lambda i: (0, 0),
                                   pipeline_mode=pl.Buffered(1))],
            out_specs=pl.BlockSpec((8, 128), lambda i: (0, 0)),
        )
        jax.block_until_ready(fn(jnp.zeros((8, 128), jnp.float32)))
        return True
    except Exception:
        return False


def _invariant(shape):
    n = len(shape)
    idx = lambda bb, _n=n: (0,) * _n
    if _single_buffer_ok():
        return pl.BlockSpec(shape, idx, pipeline_mode=pl.Buffered(1))
    return pl.BlockSpec(shape, idx)


# --------------------------------------------------------------------------
# in-kernel helpers
# --------------------------------------------------------------------------
def _silu(x):
    return x * (1.0 / (1.0 + jnp.exp(-x)))


def _group_norm(h2d, mg, gamma, beta, group_size):
    """GroupNorm on a flattened (H*W, C) f32 tile for one sample.

    mg is the (C, C) group-membership matrix (mg[i, j] = 1 iff channels i and j
    share a group), so `stats @ mg` both reduces within a group and broadcasts
    the group statistic back to every member channel.  Sum and sum-of-squares
    are stacked into a single (2, C) matmul.
    """
    stats = jnp.concatenate(
        [jnp.sum(h2d, axis=0, keepdims=True),
         jnp.sum(h2d * h2d, axis=0, keepdims=True)], axis=0)           # (2, C)
    g = jnp.dot(stats, mg, preferred_element_type=jnp.float32)         # (2, C)
    cnt = float(h2d.shape[0] * group_size)
    mean = g[0:1, :] / cnt
    # one-pass E[x^2] - mean^2 clamped at 0 (guards rsqrt against cancellation)
    var = jnp.maximum(g[1:2, :] / cnt - mean * mean, 0.0)
    inv = jax.lax.rsqrt(var + EPS)
    return (h2d - mean) * inv * gamma + beta


def _conv3x3(pad_ref, col_ref, h_hwc, w_ref, H, W, cin, cout, nine_tap):
    """SAME 3x3 conv of one (H, W, cin) sample via bf16 im2col matmul(s).

    pad_ref: (H+2, W+2, >=cin) bf16 scratch (only the 1-pixel border is
             zeroed, interior fully overwritten each call).
    col_ref: (H*W, >= (9 or 3)*cin) bf16 scratch.
    w_ref  : (9*cin, cout) bf16 weights (HWIO flattened).
    nine_tap=True : one (H*W, 9*cin) @ (9*cin, cout) matmul.
    nine_tap=False: 3 accumulating matmuls with K = 3*cin (3x smaller col
                    scratch, used for large cin).
    Returns (H*W, cout) f32 (bias not included).
    """
    zr = jnp.zeros((1, W + 2, cin), jnp.bfloat16)
    zc = jnp.zeros((H + 2, 1, cin), jnp.bfloat16)
    pad_ref[0:1, :, 0:cin] = zr
    pad_ref[H + 1:H + 2, :, 0:cin] = zr
    pad_ref[:, 0:1, 0:cin] = zc
    pad_ref[:, W + 1:W + 2, 0:cin] = zc
    pad_ref[1:H + 1, 1:W + 1, 0:cin] = h_hwc.astype(jnp.bfloat16)

    if nine_tap:
        for t in range(9):
            ky, kx = divmod(t, 3)
            col_ref[:, t * cin:(t + 1) * cin] = (
                pad_ref[ky:ky + H, kx:kx + W, 0:cin].reshape(H * W, cin))
        return jnp.dot(col_ref[:, 0:9 * cin], w_ref[...],
                       preferred_element_type=jnp.float32)

    acc = None
    for ky in range(3):
        for kx in range(3):
            col_ref[:, kx * cin:(kx + 1) * cin] = (
                pad_ref[ky:ky + H, kx:kx + W, 0:cin].reshape(H * W, cin))
        part = jnp.dot(col_ref[:, 0:3 * cin],
                       w_ref[ky * 3 * cin:(ky + 1) * 3 * cin, :],
                       preferred_element_type=jnp.float32)
        acc = part if acc is None else acc + part
    return acc


# --------------------------------------------------------------------------
# kernel bodies
# --------------------------------------------------------------------------
def conv3x3_kernel(H, W, cin, cout, nine_tap,
                   x_ref, w_ref, b_ref, out_ref, pad, col):
    acc = _conv3x3(pad, col, x_ref[...], w_ref, H, W, cin, cout, nine_tap)
    out_ref[...] = (acc + b_ref[...]).reshape(H, W, cout).astype(out_ref.dtype)


def norm_silu_conv3x3_kernel(H, W, cin, cout, nine_tap,
                             x_ref, mg_ref, g_ref, b_ref, w_ref, cb_ref,
                             out_ref, pad, col):
    x2 = x_ref[...].reshape(H * W, cin).astype(jnp.float32)
    h = _silu(_group_norm(x2, mg_ref[...], g_ref[...], b_ref[...],
                          cin // NUM_GROUPS))
    acc = _conv3x3(pad, col, h.reshape(H, W, cin), w_ref, H, W, cin, cout,
                   nine_tap)
    out_ref[...] = (acc + cb_ref[...]).reshape(H, W, cout).astype(out_ref.dtype)


def resnet_block_kernel(H, W, cin, cout, nine1, nine2, use_nin, *refs):
    if use_nin:
        (x_ref, mg_in, mg_out, g1, b1, w1, c1b, g2, b2, w2, c2b, wn, bn,
         out_ref, pad, col) = refs
    else:
        (x_ref, mg_in, g1, b1, w1, c1b, g2, b2, w2, c2b,
         out_ref, pad, col) = refs
        mg_out = mg_in

    x2 = x_ref[...].reshape(H * W, cin).astype(jnp.float32)

    # norm1 -> SiLU -> conv1 (3x3, pad 1).  Decoder has temb_channels == 0.
    h = _silu(_group_norm(x2, mg_in[...], g1[...], b1[...], cin // NUM_GROUPS))
    h = _conv3x3(pad, col, h.reshape(H, W, cin), w1, H, W, cin, cout,
                 nine1) + c1b[...]

    # norm2 -> SiLU -> dropout (identity in eval) -> conv2 (3x3, pad 1).
    # pad/col scratch is REUSED: the two conv stages are strictly sequential.
    h2 = _silu(_group_norm(h, mg_out[...], g2[...], b2[...],
                           cout // NUM_GROUPS))
    h2 = _conv3x3(pad, col, h2.reshape(H, W, cout), w2, H, W, cout, cout,
                  nine2) + c2b[...]

    # shortcut: nin_shortcut (1x1 conv) only when Cin != Cout, else identity
    if use_nin:
        sc = jnp.dot(x2.astype(jnp.bfloat16), wn[...],
                     preferred_element_type=jnp.float32) + bn[...]
    else:
        sc = x2
    out_ref[...] = (sc + h2).reshape(H, W, cout).astype(out_ref.dtype)


def attn_block_kernel(H, W, C,
                      x_ref, mg, g, b, wq, bq, wk, bk, wv, bv, wp, bp, out_ref):
    # TODO(synk): flash-style KV tiling once H*W >= ~2048 (a full (HW,HW) f32
    #             score buffer would exceed v7x VMEM); fine at these sizes.
    HW = H * W
    x2 = x_ref[...].reshape(HW, C).astype(jnp.float32)
    h = _group_norm(x2, mg[...], g[...], b[...], C // NUM_GROUPS)
    hb = h.astype(jnp.bfloat16)
    q = jnp.dot(hb, wq[...], preferred_element_type=jnp.float32) + bq[...]
    k = jnp.dot(hb, wk[...], preferred_element_type=jnp.float32) + bk[...]
    v = jnp.dot(hb, wv[...], preferred_element_type=jnp.float32) + bv[...]
    # fold the 1/sqrt(C) scale into q (O(HW*C) instead of O(HW^2))
    qs = (q * (float(C) ** -0.5)).astype(jnp.bfloat16)
    s = jax.lax.dot_general(qs, k.astype(jnp.bfloat16),
                            dimension_numbers=(((1,), (1,)), ((), ())),
                            preferred_element_type=jnp.float32)
    s = s - jnp.max(s, axis=-1, keepdims=True)
    e = jnp.exp(s)
    # normalize AFTER attn @ V (per-row scalar); reciprocal on the EUP slot
    r = pl.reciprocal(jnp.sum(e, axis=-1, keepdims=True), approx=True)
    o = jnp.dot(e.astype(jnp.bfloat16), v.astype(jnp.bfloat16),
                preferred_element_type=jnp.float32) * r
    o = jnp.dot(o.astype(jnp.bfloat16), wp[...],
                preferred_element_type=jnp.float32) + bp[...]
    out_ref[...] = (x2 + o).reshape(H, W, C).astype(out_ref.dtype)


# --------------------------------------------------------------------------
# pallas_call builders (memoized per shape) and thin wrappers
# --------------------------------------------------------------------------
@functools.lru_cache(maxsize=None)
def _build_conv3x3(B, H, W, cin, cout, nine_tap, out_dtype):
    kern = functools.partial(conv3x3_kernel, H, W, cin, cout, nine_tap)
    kcol = (9 if nine_tap else 3) * cin
    return pl.pallas_call(
        kern,
        out_shape=jax.ShapeDtypeStruct((B, H, W, cout), out_dtype),
        grid=(B,),
        in_specs=[
            pl.BlockSpec((None, H, W, cin), lambda bb: (bb, 0, 0, 0)),
            _invariant((9 * cin, cout)),
            _invariant((1, cout)),
        ],
        out_specs=pl.BlockSpec((None, H, W, cout), lambda bb: (bb, 0, 0, 0)),
        scratch_shapes=[
            pltpu.VMEM((H + 2, W + 2, cin), jnp.bfloat16),
            pltpu.VMEM((H * W, kcol), jnp.bfloat16),
        ],
        compiler_params=_cparams(),
    )


def conv3x3_pallas(x, cp, *, out_dtype=jnp.bfloat16, nine_tap=None):
    B, H, W, cin = x.shape
    cout = cp["w2d"].shape[-1]
    if nine_tap is None:
        nine_tap = cin <= _NINE_TAP_MAX_CIN
    fn = _build_conv3x3(B, H, W, cin, cout, bool(nine_tap), out_dtype)
    return fn(x, cp["w2d"], cp["b"])


@functools.lru_cache(maxsize=None)
def _build_norm_silu_conv3x3(B, H, W, cin, cout, nine_tap, out_dtype):
    kern = functools.partial(norm_silu_conv3x3_kernel, H, W, cin, cout,
                             nine_tap)
    kcol = (9 if nine_tap else 3) * cin
    return pl.pallas_call(
        kern,
        out_shape=jax.ShapeDtypeStruct((B, H, W, cout), out_dtype),
        grid=(B,),
        in_specs=[
            pl.BlockSpec((None, H, W, cin), lambda bb: (bb, 0, 0, 0)),
            _invariant((cin, cin)),
            _invariant((1, cin)), _invariant((1, cin)),
            _invariant((9 * cin, cout)), _invariant((1, cout)),
        ],
        out_specs=pl.BlockSpec((None, H, W, cout), lambda bb: (bb, 0, 0, 0)),
        scratch_shapes=[
            pltpu.VMEM((H + 2, W + 2, cin), jnp.bfloat16),
            pltpu.VMEM((H * W, kcol), jnp.bfloat16),
        ],
        compiler_params=_cparams(),
    )


def norm_silu_conv3x3_pallas(x, norm_p, conv_p, *, out_dtype=jnp.float32,
                             nine_tap=None):
    B, H, W, cin = x.shape
    cout = conv_p["w2d"].shape[-1]
    if nine_tap is None:
        nine_tap = cin <= _NINE_TAP_MAX_CIN
    fn = _build_norm_silu_conv3x3(B, H, W, cin, cout, bool(nine_tap), out_dtype)
    return fn(x, norm_p["mg"], norm_p["g"], norm_p["b"],
              conv_p["w2d"], conv_p["b"])


@functools.lru_cache(maxsize=None)
def _build_resnet(B, H, W, cin, cout, nine1, nine2, use_nin, out_dtype):
    kern = functools.partial(resnet_block_kernel, H, W, cin, cout,
                             nine1, nine2, use_nin)
    cmax = max(cin, cout)
    kmax = max((9 if nine1 else 3) * cin, (9 if nine2 else 3) * cout)
    in_specs = [pl.BlockSpec((None, H, W, cin), lambda bb: (bb, 0, 0, 0)),
                _invariant((cin, cin))]
    if use_nin:
        in_specs.append(_invariant((cout, cout)))
    in_specs += [_invariant((1, cin)), _invariant((1, cin)),
                 _invariant((9 * cin, cout)), _invariant((1, cout)),
                 _invariant((1, cout)), _invariant((1, cout)),
                 _invariant((9 * cout, cout)), _invariant((1, cout))]
    if use_nin:
        in_specs += [_invariant((cin, cout)), _invariant((1, cout))]
    return pl.pallas_call(
        kern,
        out_shape=jax.ShapeDtypeStruct((B, H, W, cout), out_dtype),
        grid=(B,),
        in_specs=in_specs,
        out_specs=pl.BlockSpec((None, H, W, cout), lambda bb: (bb, 0, 0, 0)),
        scratch_shapes=[
            pltpu.VMEM((H + 2, W + 2, cmax), jnp.bfloat16),
            pltpu.VMEM((H * W, kmax), jnp.bfloat16),
        ],
        compiler_params=_cparams(),
    )


def resnet_block_pallas(x, rp, *, out_dtype=jnp.bfloat16):
    B, H, W, cin = x.shape
    cout = rp["w1"].shape[-1]
    use_nin = "wn" in rp
    nine1 = cin <= _NINE_TAP_MAX_CIN
    nine2 = cout <= _NINE_TAP_MAX_CIN
    fn = _build_resnet(B, H, W, cin, cout, nine1, nine2, use_nin, out_dtype)
    args = [x, rp["mg_in"]]
    if use_nin:
        args.append(rp["mg_out"])
    args += [rp["g1"], rp["b1"], rp["w1"], rp["c1b"],
             rp["g2"], rp["b2"], rp["w2"], rp["c2b"]]
    if use_nin:
        args += [rp["wn"], rp["bn"]]
    return fn(*args)


@functools.lru_cache(maxsize=None)
def _build_attn(B, H, W, C, out_dtype):
    kern = functools.partial(attn_block_kernel, H, W, C)
    return pl.pallas_call(
        kern,
        out_shape=jax.ShapeDtypeStruct((B, H, W, C), out_dtype),
        grid=(B,),
        in_specs=[pl.BlockSpec((None, H, W, C), lambda bb: (bb, 0, 0, 0)),
                  _invariant((C, C)),
                  _invariant((1, C)), _invariant((1, C)),
                  _invariant((C, C)), _invariant((1, C)),
                  _invariant((C, C)), _invariant((1, C)),
                  _invariant((C, C)), _invariant((1, C)),
                  _invariant((C, C)), _invariant((1, C))],
        out_specs=pl.BlockSpec((None, H, W, C), lambda bb: (bb, 0, 0, 0)),
        compiler_params=_cparams(),
    )


def attn_block_pallas(x, ap, *, out_dtype=jnp.bfloat16):
    B, H, W, C = x.shape
    fn = _build_attn(B, H, W, C, out_dtype)
    return fn(x, ap["mg"], ap["g"], ap["b"],
              ap["wq"], ap["bq"], ap["wk"], ap["bk"],
              ap["wv"], ap["bv"], ap["wp"], ap["bp"])


# --------------------------------------------------------------------------
# one-time host-side parameter preparation (bf16 weights, rows, group mats)
# --------------------------------------------------------------------------
def _row(v):
    return jnp.asarray(v).reshape(1, -1).astype(jnp.float32)


def _w2d_bf16(w_hwio):
    kh, kw, cin, cout = w_hwio.shape
    return jnp.asarray(w_hwio).reshape(kh * kw * cin, cout).astype(jnp.bfloat16)


def _group_mat(c):
    gid = jnp.arange(c) // (c // NUM_GROUPS)
    return (gid[:, None] == gid[None, :]).astype(jnp.float32)


def _prep_conv(p):
    return {"w2d": _w2d_bf16(p["w"]), "b": _row(p["b"])}


def _prep_resnet(p):
    cin, cout = p["w1"].shape[2], p["w1"].shape[3]
    r = {"mg_in": _group_mat(cin),
         "g1": _row(p["g1"]), "b1": _row(p["b1"]),
         "w1": _w2d_bf16(p["w1"]), "c1b": _row(p["c1b"]),
         "g2": _row(p["g2"]), "b2": _row(p["b2"]),
         "w2": _w2d_bf16(p["w2"]), "c2b": _row(p["c2b"])}
    if "wn" in p:
        r["mg_out"] = _group_mat(cout)
        r["wn"] = jnp.asarray(p["wn"]).astype(jnp.bfloat16)
        r["bn"] = _row(p["bn"])
    return r


def _prep_attn(p):
    return {"mg": _group_mat(p["wq"].shape[0]),
            "g": _row(p["g"]), "b": _row(p["b"]),
            "wq": jnp.asarray(p["wq"]).astype(jnp.bfloat16), "bq": _row(p["bq"]),
            "wk": jnp.asarray(p["wk"]).astype(jnp.bfloat16), "bk": _row(p["bk"]),
            "wv": jnp.asarray(p["wv"]).astype(jnp.bfloat16), "bv": _row(p["bv"]),
            "wp": jnp.asarray(p["wp"]).astype(jnp.bfloat16), "bp": _row(p["bp"])}


def prepare_decoder_params(P):
    """One-time conversion of raw f32 params into kernel-ready form so nothing
    is rebuilt / re-uploaded every forward call."""
    KP = {"conv_in": _prep_conv(P["conv_in"]),
          "mid": {"block_1": _prep_resnet(P["mid"]["block_1"]),
                  "attn_1": _prep_attn(P["mid"]["attn_1"]),
                  "block_2": _prep_resnet(P["mid"]["block_2"])},
          "up": []}
    for lvl in P["up"]:
        l = {"block": [_prep_resnet(bp) for bp in lvl["block"]],
             "attn": [_prep_attn(ap) for ap in lvl["attn"]]}
        if "upsample" in lvl:
            l["upsample"] = _prep_conv(lvl["upsample"])
        KP["up"].append(l)
    KP["norm_out"] = {"mg": _group_mat(P["norm_out"]["g"].shape[0]),
                      "g": _row(P["norm_out"]["g"]),
                      "b": _row(P["norm_out"]["b"])}
    KP["conv_out"] = _prep_conv(P["conv_out"])
    return KP


# --------------------------------------------------------------------------
# Decoder forward (Pallas) -- bf16 activations between kernels, f32 output
# --------------------------------------------------------------------------
def decoder_forward_pallas(z, KP, cfg):
    num_resolutions = len(cfg["ch_mult"])
    h = conv3x3_pallas(z, KP["conv_in"])
    h = resnet_block_pallas(h, KP["mid"]["block_1"])
    h = attn_block_pallas(h, KP["mid"]["attn_1"])
    h = resnet_block_pallas(h, KP["mid"]["block_2"])
    for i_level in reversed(range(num_resolutions)):
        lvl = KP["up"][i_level]
        for i_block in range(cfg["num_res_blocks"] + 1):
            h = resnet_block_pallas(h, lvl["block"][i_block])
            if lvl["attn"]:
                h = attn_block_pallas(h, lvl["attn"][i_block])
        if i_level != 0:
            # nearest-neighbour 2x upsample between kernels (bf16, so half the
            # HBM traffic of the old f32 round trip).
            # TODO(synk): fuse the upsample into the conv kernel's im2col build
            #             (per-parity taps) to remove this HBM round trip.
            h = jnp.repeat(jnp.repeat(h, 2, axis=1), 2, axis=2)
            h = conv3x3_pallas(h, lvl["upsample"])
    # give_pre_end=False, tanh_out=False
    return norm_silu_conv3x3_pallas(h, KP["norm_out"], KP["conv_out"],
                                    out_dtype=jnp.float32)


# --------------------------------------------------------------------------
# pure-JAX f32 reference (end-to-end correctness check)
# --------------------------------------------------------------------------
def _ref_gn(h, gamma, beta):
    B, H, W, C = h.shape
    hr = h.reshape(B, H, W, NUM_GROUPS, C // NUM_GROUPS)
    mean = hr.mean(axis=(1, 2, 4), keepdims=True)
    var = hr.var(axis=(1, 2, 4), keepdims=True)
    hn = ((hr - mean) / jnp.sqrt(var + EPS)).reshape(B, H, W, C)
    return hn * gamma.reshape(1, 1, 1, C) + beta.reshape(1, 1, 1, C)


def _ref_silu(x):
    return x * jax.nn.sigmoid(x)


def _ref_conv3x3(h, w, b):
    y = jax.lax.conv_general_dilated(h, w, (1, 1), "SAME",
                                     dimension_numbers=("NHWC", "HWIO", "NHWC"))
    return y + b.reshape(1, 1, 1, -1)


def _ref_resnet(x, p):
    h = _ref_conv3x3(_ref_silu(_ref_gn(x, p["g1"], p["b1"])), p["w1"], p["c1b"])
    h = _ref_conv3x3(_ref_silu(_ref_gn(h, p["g2"], p["b2"])), p["w2"], p["c2b"])
    if "wn" in p:
        x = jnp.einsum("bhwc,cd->bhwd", x, p["wn"]) + p["bn"].reshape(1, 1, 1, -1)
    return x + h


def _ref_attn(x, p):
    B, H, W, C = x.shape
    h = _ref_gn(x, p["g"], p["b"]).reshape(B, H * W, C)
    q = h @ p["wq"] + p["bq"]
    k = h @ p["wk"] + p["bk"]
    v = h @ p["wv"] + p["bv"]
    s = jnp.einsum("bqc,bkc->bqk", q, k) * (float(C) ** -0.5)
    a = jax.nn.softmax(s, axis=-1)
    o = jnp.einsum("bqk,bkc->bqc", a, v) @ p["wp"] + p["bp"]
    return x + o.reshape(B, H, W, C)


def decoder_forward_ref(z, P, cfg):
    num_resolutions = len(cfg["ch_mult"])
    h = _ref_conv3x3(z, P["conv_in"]["w"], P["conv_in"]["b"])
    h = _ref_resnet(h, P["mid"]["block_1"])
    h = _ref_attn(h, P["mid"]["attn_1"])
    h = _ref_resnet(h, P["mid"]["block_2"])
    for i_level in reversed(range(num_resolutions)):
        lvl = P["up"][i_level]
        for i_block in range(cfg["num_res_blocks"] + 1):
            h = _ref_resnet(h, lvl["block"][i_block])
            if lvl["attn"]:
                h = _ref_attn(h, lvl["attn"][i_block])
        if i_level != 0:
            h = jnp.repeat(jnp.repeat(h, 2, axis=1), 2, axis=2)
            h = _ref_conv3x3(h, lvl["upsample"]["w"], lvl["upsample"]["b"])
    return _ref_conv3x3(
        _ref_silu(_ref_gn(h, P["norm_out"]["g"], P["norm_out"]["b"])),
        P["conv_out"]["w"], P["conv_out"]["b"])


# --------------------------------------------------------------------------
# numpy references that MIMIC the kernels' bf16 casting (tight unit checks)
# --------------------------------------------------------------------------
def _bf16_round(x):
    return np.asarray(jnp.asarray(x).astype(jnp.bfloat16).astype(jnp.float32))


def _np_conv3x3_pre(xb, wb, b):
    B, H, W, cin = xb.shape
    cout = wb.shape[-1]
    xp = np.zeros((B, H + 2, W + 2, cin), np.float32)
    xp[:, 1:H + 1, 1:W + 1, :] = xb
    out = np.zeros((B, H, W, cout), np.float32)
    for ky in range(3):
        for kx in range(3):
            out += np.einsum("bhwc,cd->bhwd", xp[:, ky:ky + H, kx:kx + W, :],
                             wb[ky, kx]).astype(np.float32)
    return out + np.asarray(b, np.float32).reshape(1, 1, 1, -1)


def _np_conv3x3_bf16(x, w, b):
    return _np_conv3x3_pre(_bf16_round(x), _bf16_round(w), b)


def _np_gn(x, gamma, beta):
    B, H, W, C = x.shape
    xr = x.reshape(B, H, W, NUM_GROUPS, C // NUM_GROUPS)
    mean = xr.mean(axis=(1, 2, 4), keepdims=True)
    var = xr.var(axis=(1, 2, 4), keepdims=True)
    xn = ((xr - mean) / np.sqrt(var + EPS)).reshape(B, H, W, C)
    return (xn * np.asarray(gamma, np.float32).reshape(1, 1, 1, C)
            + np.asarray(beta, np.float32).reshape(1, 1, 1, C))


def _np_silu(x):
    return x / (1.0 + np.exp(-x))


def _np_resnet_bf16(x, p):
    h = _np_silu(_np_gn(x, p["g1"], p["b1"]))
    h = _np_conv3x3_bf16(h, p["w1"], p["c1b"])
    h = _np_silu(_np_gn(h, p["g2"], p["b2"]))
    h = _np_conv3x3_bf16(h, p["w2"], p["c2b"])
    if "wn" in p:
        sc = (np.einsum("bhwc,cd->bhwd", _bf16_round(x), _bf16_round(p["wn"]))
              .astype(np.float32)
              + np.asarray(p["bn"], np.float32).reshape(1, 1, 1, -1))
    else:
        sc = x
    return sc + h


# --------------------------------------------------------------------------
# parameter construction mirroring the PyTorch Decoder __init__
# --------------------------------------------------------------------------
def make_decoder_params(key, *, ch, out_ch, ch_mult, num_res_blocks,
                        attn_resolutions, resolution, z_channels):
    keys = jax.random.split(key, 512)
    counter = [0]

    def nxt():
        k = keys[counter[0]]
        counter[0] += 1
        return k

    def w_init(shape, scale=0.1):
        return (scale * jax.random.normal(nxt(), shape)).astype(jnp.float32)

    def gn_params(c):
        return (1.0 + 0.05 * jax.random.normal(nxt(), (c,)).astype(jnp.float32),
                0.05 * jax.random.normal(nxt(), (c,)).astype(jnp.float32))

    def conv3(cin, cout):
        return {"w": w_init((3, 3, cin, cout)), "b": w_init((cout,))}

    def resnet(cin, cout):
        g1, b1 = gn_params(cin)
        p = {"g1": g1, "b1": b1,
             "w1": w_init((3, 3, cin, cout)), "c1b": w_init((cout,))}
        g2, b2 = gn_params(cout)
        p.update({"g2": g2, "b2": b2,
                  "w2": w_init((3, 3, cout, cout)), "c2b": w_init((cout,))})
        if cin != cout:
            p["wn"] = w_init((cin, cout))   # nin_shortcut (1x1 conv), (in, out)
            p["bn"] = w_init((cout,))
        return p

    def attn(c):
        g, b = gn_params(c)
        return {"g": g, "b": b,
                "wq": w_init((c, c)), "bq": w_init((c,)),
                "wk": w_init((c, c)), "bk": w_init((c,)),
                "wv": w_init((c, c)), "bv": w_init((c,)),
                "wp": w_init((c, c)), "bp": w_init((c,))}

    num_resolutions = len(ch_mult)
    block_in = ch * ch_mult[num_resolutions - 1]
    curr_res = resolution // 2 ** (num_resolutions - 1)

    P = {"conv_in": conv3(z_channels, block_in),
         "mid": {"block_1": resnet(block_in, block_in),
                 "attn_1": attn(block_in),
                 "block_2": resnet(block_in, block_in)},
         "up": [None] * num_resolutions}

    for i_level in reversed(range(num_resolutions)):
        block_out = ch * ch_mult[i_level]
        blocks, attns = [], []
        for _ in range(num_res_blocks + 1):
            blocks.append(resnet(block_in, block_out))
            block_in = block_out
            if curr_res in attn_resolutions:
                attns.append(attn(block_in))
        lvl = {"block": blocks, "attn": attns}
        if i_level != 0:
            lvl["upsample"] = conv3(block_in, block_in)
            curr_res *= 2
        P["up"][i_level] = lvl

    g_out, b_out = gn_params(block_in)
    P["norm_out"] = {"g": g_out, "b": b_out}
    P["conv_out"] = conv3(block_in, out_ch)
    return P


# --------------------------------------------------------------------------
if __name__ == "__main__":
    # Small Decoder config (GroupNorm(32) requires channels % 32 == 0):
    # ch=32, ch_mult=(1,2) -> block_in=64, z spatial = 16 / 2 = 8, attention at
    # resolution 8 (mid + up level 1), upsample to 16x16, conv_out -> 3 chans.
    cfg = dict(ch=32, out_ch=3, ch_mult=(1, 2), num_res_blocks=1,
               attn_resolutions=(8,), resolution=16, z_channels=4)
    B = 2
    num_resolutions = len(cfg["ch_mult"])
    z_res = cfg["resolution"] // 2 ** (num_resolutions - 1)

    key = jax.random.PRNGKey(0)
    kp, kz, k1, k2, k3, k4, k5 = jax.random.split(key, 7)

    # ---- unit check 1: conv3x3 kernel (9-tap and 3-tap im2col paths) against
    #      a reference that mimics the bf16 operand casting (tight tolerance,
    #      catches tap / offset / border bugs).
    xu = jax.random.normal(k1, (2, 8, 8, 32), jnp.float32)
    wu = 0.1 * jax.random.normal(k2, (3, 3, 32, 64), jnp.float32)
    bu = 0.1 * jax.random.normal(k3, (64,), jnp.float32)
    cp_u = {"w2d": _w2d_bf16(wu), "b": _row(bu)}
    ref_u = _np_conv3x3_bf16(xu, wu, bu)
    for nt in (True, False):
        got_u = np.asarray(conv3x3_pallas(xu, cp_u, out_dtype=jnp.float32,
                                          nine_tap=nt))
        np.testing.assert_allclose(got_u, ref_u, rtol=1e-4, atol=1e-4)

    # ---- unit check 2: full ResnetBlock kernel (shared pad/col scratch + nin
    #      shortcut) against a bf16-mimicking reference.
    def _unit_resnet_params(k, cin, cout):
        ks = jax.random.split(k, 10)
        return {"g1": 1.0 + 0.05 * jax.random.normal(ks[0], (cin,)),
                "b1": 0.05 * jax.random.normal(ks[1], (cin,)),
                "w1": 0.1 * jax.random.normal(ks[2], (3, 3, cin, cout)),
                "c1b": 0.1 * jax.random.normal(ks[3], (cout,)),
                "g2": 1.0 + 0.05 * jax.random.normal(ks[4], (cout,)),
                "b2": 0.05 * jax.random.normal(ks[5], (cout,)),
                "w2": 0.1 * jax.random.normal(ks[6], (3, 3, cout, cout)),
                "c2b": 0.1 * jax.random.normal(ks[7], (cout,)),
                "wn": 0.1 * jax.random.normal(ks[8], (cin, cout)),
                "bn": 0.1 * jax.random.normal(ks[9], (cout,))}

    rp_raw = _unit_resnet_params(k4, 32, 64)
    x_r = jax.random.normal(k5, (2, 8, 8, 32), jnp.float32)
    got_r = np.asarray(resnet_block_pallas(x_r, _prep_resnet(rp_raw),
                                           out_dtype=jnp.float32))
    ref_r = _np_resnet_bf16(np.asarray(x_r), rp_raw)
    np.testing.assert_allclose(got_r, ref_r, rtol=1e-2, atol=1e-2)

    # ---- end-to-end decoder forward vs pure-JAX f32 reference
    P = make_decoder_params(kp, **cfg)
    KP = prepare_decoder_params(P)
    z = jax.random.normal(kz, (B, z_res, z_res, cfg["z_channels"]), jnp.float32)

    fwd = jax.jit(lambda z_, params: decoder_forward_pallas(z_, params, cfg))
    out = jax.block_until_ready(fwd(z, KP))
    ref = jax.block_until_ready(decoder_forward_ref(z, P, cfg))

    # tolerance sized for the bf16 weight + bf16 inter-kernel activation chain
    # across ~14 conv layers (tight per-block checks above cover indexing).
    np.testing.assert_allclose(np.asarray(out), np.asarray(ref),
                               rtol=6e-2, atol=2e-1)
    print("KERNEL_OK")
</pallas_src>

<mosaic_0001>
module attributes {stable_mosaic.version = 11 : i64} {
  func.func @_sb_probe_kernel(%arg0: i32, %arg1: memref<8x128xf32, #tpu.memory_space<vmem>>, %arg2: memref<8x128xf32, #tpu.memory_space<vmem>>) attributes {dimension_semantics = [#tpu.dimension_semantics<arbitrary>], iteration_bounds = array<i64: 1>, scalar_prefetch = 0 : i64, scratch_operands = 0 : i64, tpu.core_type = #tpu.core_type<tc>, window_params = [{pipeline_mode = #tpu.pipeline_mode<synchronous>, transform_indices = @transform_0, window_bounds = array<i64: 8, 128>}, {pipeline_mode = #tpu.pipeline_mode<synchronous>, transform_indices = @transform_1, window_bounds = array<i64: 8, 128>}]} {
    %c0 = arith.constant 0 : index
    %c0_0 = arith.constant 0 : index
    %0 = vector.load %arg1[%c0, %c0_0] : memref<8x128xf32, #tpu.memory_space<vmem>>, vector<8x128xf32>
    %c0_1 = arith.constant 0 : index
    %c0_2 = arith.constant 0 : index
    %1 = vector.load %arg2[%c0_1, %c0_2] : memref<8x128xf32, #tpu.memory_space<vmem>>, vector<8x128xf32>
    tpu.vector_store %arg2[%c0_1, %c0_2], %0 {strides = array<i32>} : memref<8x128xf32, #tpu.memory_space<vmem>>, vector<8x128xf32>,
    return
  }
  func.func @transform_0(%arg0: i32) -> (i32, i32) {
    %c0_i32 = arith.constant 0 : i32
    %c0_i32_0 = arith.constant 0 : i32
    %c0_i32_1 = arith.constant 0 : i32
    return %c0_i32, %c0_i32_0 : i32, i32
  }
  func.func @transform_1(%arg0: i32) -> (i32, i32) {
    %c0_i32 = arith.constant 0 : i32
    %c0_i32_0 = arith.constant 0 : i32
    %c0_i32_1 = arith.constant 0 : i32
    return %c0_i32, %c0_i32_0 : i32, i32
  }
}

module attributes {stable_mosaic.version = 11 : i64} {
  func.func @conv3x3_kernel(%arg0: i32, %arg1: memref<1x8x8x32xf32, #tpu.memory_space<vmem>>, %arg2: memref<288x64xbf16, #tpu.memory_space<vmem>>, %arg3: memref<1x64xf32, #tpu.memory_space<vmem>>, %arg4: memref<1x8x8x64xf32, #tpu.memory_space<vmem>>, %arg5: memref<10x10x32xbf16, #tpu.memory_space<vmem>>, %arg6: memref<64x288xbf16, #tpu.memory_space<vmem>>) attributes {dimension_semantics = [#tpu.dimension_semantics<parallel>], iteration_bounds = array<i64: 2>, scalar_prefetch = 0 : i64, scratch_operands = 2 : i64, tpu.core_type = #tpu.core_type<tc>, window_params = [{transform_indices = @transform_0, window_bounds = array<i64: 1, 8, 8, 32>}, {pipeline_mode = #tpu.pipeline_mode<synchronous>, transform_indices = @transform_1, window_bounds = array<i64: 288, 64>}, {pipeline_mode = #tpu.pipeline_mode<synchronous>, transform_indices = @transform_2, window_bounds = array<i64: 1, 64>}, {transform_indices = @transform_3, window_bounds = array<i64: 1, 8, 8, 64>}]} {
    %c0 = arith.constant 0 : index
    %c0_0 = arith.constant 0 : index
    %c0_1 = arith.constant 0 : index
    %c0_2 = arith.constant 0 : index
    %0 = vector.load %arg1[%c0, %c0_0, %c0_1, %c0_2] : memref<1x8x8x32xf32, #tpu.memory_space<vmem>>, vector<1x8x8x32xf32>
    %1 = vector.shape_cast %0 : vector<1x8x8x32xf32> to vector<8x8x32xf32>
    %cst = arith.constant 0.000000e+00 : bf16
    %2 = vector.broadcast %cst : bf16 to vector<1x10x32xbf16>
    %cst_3 = arith.constant 0.000000e+00 : bf16
    %3 = vector.broadcast %cst_3 : bf16 to vector<10x1x32xbf16>
    %c0_4 = arith.constant 0 : index
    %c0_5 = arith.constant 0 : index
    %c0_6 = arith.constant 0 : index
    %4 = vector.load %arg5[%c0_4, %c0_5, %c0_6] : memref<10x10x32xbf16, #tpu.memory_space<vmem>>, vector<1x10x32xbf16>
    tpu.vector_store %arg5[%c0_4, %c0_5, %c0_6], %2 {strides = array<i32>} : memref<10x10x32xbf16, #tpu.memory_space<vmem>>, vector<1x10x32xbf16>,
    %c9 = arith.constant 9 : index
    %c0_7 = arith.constant 0 : index
    %c0_8 = arith.constant 0 : index
    %5 = vector.load %arg5[%c9, %c0_7, %c0_8] : memref<10x10x32xbf16, #tpu.memory_space<vmem>>, vector<1x10x32xbf16>
    tpu.vector_store %arg5[%c9, %c0_7, %c0_8], %2 {strides = array<i32>} : memref<10x10x32xbf16, #tpu.memory_space<vmem>>, vector<1x10x32xbf16>,
    %c0_9 = arith.constant 0 : index
    %c0_10 = arith.constant 0 : index
    %c0_11 = arith.constant 0 : index
    %6 = vector.load %arg5[%c0_9, %c0_10, %c0_11] : memref<10x10x32xbf16, #tpu.memory_space<vmem>>, vector<10x1x32xbf16>
    tpu.vector_store %arg5[%c0_9, %c0_10, %c0_11], %3 {strides = array<i32>} : memref<10x10x32xbf16, #tpu.memory_space<vmem>>, vector<10x1x32xbf16>,
    %c0_12 = arith.constant 0 : index
    %c9_13 = arith.constant 9 : index
    %c0_14 = arith.constant 0 : index
    %7 = vector.load %arg5[%c0_12, %c9_13, %c0_14] : memref<10x10x32xbf16, #tpu.memory_space<vmem>>, vector<10x1x32xbf16>
    tpu.vector_store %arg5[%c0_12, %c9_13, %c0_14], %3 {strides = array<i32>} : memref<10x10x32xbf16, #tpu.memory_space<vmem>>, vector<10x1x32xbf16>,
    %8 = arith.truncf %1 : vector<8x8x32xf32> to vector<8x8x32xbf16>
    %c1 = arith.constant 1 : index
    %c1_15 = arith.constant 1 : index
    %c0_16 = arith.constant 0 : index
    %9 = vector.load %arg5[%c1, %c1_15, %c0_16] : memref<10x10x32xbf16, #tpu.memory_space<vmem>>, vector<8x8x32xbf16>
    tpu.vector_store %arg5[%c1, %c1_15, %c0_16], %8 {strides = array<i32>} : memref<10x10x32xbf16, #tpu.memory_space<vmem>>, vector<8x8x32xbf16>,
    %c0_17 = arith.constant 0 : index
    %c0_18 = arith.constant 0 : index
    %c0_19 = arith.constant 0 : index
    %10 = vector.load %arg5[%c0_17, %c0_18, %c0_19] : memref<10x10x32xbf16, #tpu.memory_space<vmem>>, vector<8x8x32xbf16>
    %11 = vector.shape_cast %10 : vector<8x8x32xbf16> to vector<64x32xbf16>
    %c0_20 = arith.constant 0 : index
    %c0_21 = arith.constant 0 : index
    %12 = vector.load %arg6[%c0_20, %c0_21] : memref<64x288xbf16, #tpu.memory_space<vmem>>, vector<64x32xbf16>
    tpu.vector_store %arg6[%c0_20, %c0_21], %11 {strides = array<i32>} : memref<64x288xbf16, #tpu.memory_space<vmem>>, vector<64x32xbf16>,
    %c0_22 = arith.constant 0 : index
    %c1_23 = arith.constant 1 : index
    %c0_24 = arith.constant 0 : index
    %13 = vector.load %arg5[%c0_22, %c1_23, %c0_24] : memref<10x10x32xbf16, #tpu.memory_space<vmem>>, vector<8x8x32xbf16>
    %14 = vector.shape_cast %13 : vector<8x8x32xbf16> to vector<64x32xbf16>
    %c0_25 = arith.constant 0 : index
    %c32 = arith.constant 32 : index
    %15 = vector.load %arg6[%c0_25, %c32] : memref<64x288xbf16, #tpu.memory_space<vmem>>, vector<64x32xbf16>
    tpu.vector_store %arg6[%c0_25, %c32], %14 {strides = array<i32>} : memref<64x288xbf16, #tpu.memory_space<vmem>>, vector<64x32xbf16>,
    %c0_26 = arith.constant 0 : index
    %c2 = arith.constant 2 : index
    %c0_27 = arith.constant 0 : index
    %16 = vector.load %arg5[%c0_26, %c2, %c0_27] : memref<10x10x32xbf16, #tpu.memory_space<vmem>>, vector<8x8x32xbf16>
    %17 = vector.shape_cast %16 : vector<8x8x32xbf16> to vector<64x32xbf16>
    %c0_28 = arith.constant 0 : index
    %c64 = arith.constant 64 : index
    %18 = vector.load %arg6[%c0_28, %c64] : memref<64x288xbf16, #tpu.memory_space<vmem>>, vector<64x32xbf16>
    tpu.vector_store %arg6[%c0_28, %c64], %17 {strides = array<i32>} : memref<64x288xbf16, #tpu.memory_space<vmem>>, vector<64x32xbf16>,
    %c1_29 = arith.constant 1 : index
    %c0_30 = arith.constant 0 : index
    %c0_31 = arith.constant 0 : index
    %19 = vector.load %arg5[%c1_29, %c0_30, %c0_31] : memref<10x10x32xbf16, #tpu.memory_space<vmem>>, vector<8x8x32xbf16>
    %20 = vector.shape_cast %19 : vector<8x8x32xbf16> to vector<64x32xbf16>
    %c0_32 = arith.constant 0 : index
    %c96 = arith.constant 96 : index
    %21 = vector.load %arg6[%c0_32, %c96] : memref<64x288xbf16, #tpu.memory_space<vmem>>, vector<64x32xbf16>
    tpu.vector_store %arg6[%c0_32, %c96], %20 {strides = array<i32>} : memref<64x288xbf16, #tpu.memory_space<vmem>>, vector<64x32xbf16>,
    %c1_33 = arith.constant 1 : index
    %c1_34 = arith.constant 1 : index
    %c0_35 = arith.constant 0 : index
    %22 = vector.load %arg5[%c1_33, %c1_34, %c0_35] : memref<10x10x32xbf16, #tpu.memory_space<vmem>>, vector<8x8x32xbf16>
    %23 = vector.shape_cast %22 : vector<8x8x32xbf16> to vector<64x32xbf16>
    %c0_36 = arith.constant 0 : index
    %c128 = arith.constant 128 : index
    %24 = vector.load %arg6[%c0_36, %c128] : memref<64x288xbf16, #tpu.memory_space<vmem>>, vector<64x32xbf16>
    tpu.vector_store %arg6[%c0_36, %c128], %23 {strides = array<i32>} : memref<64x288xbf16, #tpu.memory_space<vmem>>, vector<64x32xbf16>,
    %c1_37 = arith.constant 1 : index
    %c2_38 = arith.constant 2 : index
    %c0_39 = arith.constant 0 : index
    %25 = vector.load %arg5[%c1_37, %c2_38, %c0_39] : memref<10x10x32xbf16, #tpu.memory_space<vmem>>, vector<8x8x32xbf16>
    %26 = vector.shape_cast %25 : vector<8x8x32xbf16> to vector<64x32xbf16>
    %c0_40 = arith.constant 0 : index
    %c160 = arith.constant 160 : index
    %27 = vector.load %arg6[%c0_40, %c160] : memref<64x288xbf16, #tpu.memory_space<vmem>>, vector<64x32xbf16>
    tpu.vector_store %arg6[%c0_40, %c160], %26 {strides = array<i32>} : memref<64x288xbf16, #tpu.memory_space<vmem>>, vector<64x32xbf16>,
    %c2_41 = arith.constant 2 : index
    %c0_42 = arith.constant 0 : index
    %c0_43 = arith.constant 0 : index
    %28 = vector.load %arg5[%c2_41, %c0_42, %c0_43] : memref<10x10x32xbf16, #tpu.memory_space<vmem>>, vector<8x8x32xbf16>
    %29 = vector.shape_cast %28 : vector<8x8x32xbf16> to vector<64x32xbf16>
    %c0_44 = arith.constant 0 : index
    %c192 = arith.constant 192 : index
    %30 = vector.load %arg6[%c0_44, %c192] : memref<64x288xbf16, #tpu.memory_space<vmem>>, vector<64x32xbf16>
    tpu.vector_store %arg6[%c0_44, %c192], %29 {strides = array<i32>} : memref<64x288xbf16, #tpu.memory_space<vmem>>, vector<64x32xbf16>,
    %c2_45 = arith.constant 2 : index
    %c1_46 = arith.constant 1 : index
    %c0_47 = arith.constant 0 : index
    %31 = vector.load %arg5[%c2_45, %c1_46, %c0_47] : memref<10x10x32xbf16, #tpu.memory_space<vmem>>, vector<8x8x32xbf16>
    %32 = vector.shape_cast %31 : vector<8x8x32xbf16> to vector<64x32xbf16>
    %c0_48 = arith.constant 0 : index
    %c224 = arith.constant 224 : index
    %33 = vector.load %arg6[%c0_48, %c224] : memref<64x288xbf16, #tpu.memory_space<vmem>>, vector<64x32xbf16>
    tpu.vector_store %arg6[%c0_48, %c224], %32 {strides = array<i32>} : memref<64x288xbf16, #tpu.memory_space<vmem>>, vector<64x32xbf16>,
    %c2_49 = arith.constant 2 : index
    %c2_50 = arith.constant 2 : index
    %c0_51 = arith.constant 0 : index
    %34 = vector.load %arg5[%c2_49, %c2_50, %c0_51] : memref<10x10x32xbf16, #tpu.memory_space<vmem>>, vector<8x8x32xbf16>
    %35 = vector.shape_cast %34 : vector<8x8x32xbf16> to vector<64x32xbf16>
    %c0_52 = arith.constant 0 : index
    %c256 = arith.constant 256 : index
    %36 = vector.load %arg6[%c0_52, %c256] : memref<64x288xbf16, #tpu.memory_space<vmem>>, vector<64x32xbf16>
    tpu.vector_store %arg6[%c0_52, %c256], %35 {strides = array<i32>} : memref<64x288xbf16, #tpu.memory_space<vmem>>, vector<64x32xbf16>,
    %c0_53 = arith.constant 0 : index
    %c0_54 = arith.constant 0 : index
    %37 = vector.load %arg6[%c0_53, %c0_54] : memref<64x288xbf16, #tpu.memory_space<vmem>>, vector<64x288xbf16>
    %c0_55 = arith.constant 0 : index
    %c0_56 = arith.constant 0 : index
    %38 = vector.load %arg2[%c0_55, %c0_56] : memref<288x64xbf16, #tpu.memory_space<vmem>>, vector<288x64xbf16>
    %cst_57 = arith.constant dense<0.000000e+00> : vector<64x64xf32>
    %39 = tpu.matmul %37, %38, %cst_57 {dimension_numbers = #tpu.dot_dimension_numbers<[1], [0], [0], [1], [0, 0, 1, 1], [], []>} : vector<64x288xbf16>, vector<288x64xbf16>, vector<64x64xf32> -> vector<64x64xf32>
    %c0_58 = arith.constant 0 : index
    %c0_59 = arith.constant 0 : index
    %40 = vector.load %arg3[%c0_58, %c0_59] : memref<1x64xf32, #tpu.memory_space<vmem>>, vector<1x64xf32>
    %41 = vector.broadcast %40 : vector<1x64xf32> to vector<64x64xf32>
    %42 = arith.addf %39, %41 : vector<64x64xf32>
    %43 = vector.shape_cast %42 : vector<64x64xf32> to vector<8x8x64xf32>
    %c0_60 = arith.constant 0 : index
    %c0_61 = arith.constant 0 : index
    %c0_62 = arith.constant 0 : index
    %c0_63 = arith.constant 0 : index
    %44 = vector.load %arg4[%c0_60, %c0_61, %c0_62, %c0_63] : memref<1x8x8x64xf32, #tpu.memory_space<vmem>>, vector<1x8x8x64xf32>
    %45 = vector.shape_cast %44 : vector<1x8x8x64xf32> to vector<8x8x64xf32>
    %46 = vector.shape_cast %43 : vector<8x8x64xf32> to vector<1x8x8x64xf32>
    tpu.vector_store %arg4[%c0_60, %c0_61, %c0_62, %c0_63], %46 {strides = array<i32>} : memref<1x8x8x64xf32, #tpu.memory_space<vmem>>, vector<1x8x8x64xf32>,
    return
  }
  func.func @transform_0(%arg0: i32) -> (i32, i32, i32, i32) {
    %c0_i32 = arith.constant 0 : i32
    %c0_i32_0 = arith.constant 0 : i32
    %c0_i32_1 = arith.constant 0 : i32
    %c0_i32_2 = arith.constant 0 : i32
    return %arg0, %c0_i32, %c0_i32_0, %c0_i32_1 : i32, i32, i32, i32
  }
  func.func @transform_1(%arg0: i32) -> (i32, i32) {
    %c0_i32 = arith.constant 0 : i32
    %c0_i32_0 = arith.constant 0 : i32
    %c0_i32_1 = arith.constant 0 : i32
    return %c0_i32, %c0_i32_0 : i32, i32
  }
  func.func @transform_2(%arg0: i32) -> (i32, i32) {
    %c0_i32 = arith.constant 0 : i32
    %c0_i32_0 = arith.constant 0 : i32
    %c0_i32_1 = arith.constant 0 : i32
    return %c0_i32, %c0_i32_0 : i32, i32
  }
  func.func @transform_3(%arg0: i32) -> (i32, i32, i32, i32) {
    %c0_i32 = arith.constant 0 : i32
    %c0_i32_0 = arith.constant 0 : i32
    %c0_i32_1 = arith.constant 0 : i32
    %c0_i32_2 = arith.constant 0 : i32
    return %arg0, %c0_i32, %c0_i32_0, %c0_i32_1 : i32, i32, i32, i32
  }
}

</mosaic_0001>

<bundles_post_ra>
// kernel: tpu_custom_call.1
= control target key start
LH: loop header
LB: loop body
LE: loop exit
PB: predicated region body
PF: predicated region fallthrough
CT: control target
= control target key end

     0   :  { %6 = vsyncpa [#allocation3], 0  ;;  %s102_s0 = inlined_call_operand.hbm [shape: f32[8,128], index: 0, kind: input, shape index: {}]   ;;  %s103_s1 = inlined_call_operand.hbm [shape: f32[8,128], index: 1, kind: output, shape index: {}]  }
   0x1   :  { %7 = vsyncpa [#allocation4], 0  ;;  %s84_s6 = smov [#allocation2]  }
   0x2   :  { %s14_s7 = sshll.u32 %s84_s6, 4  ;;  %s15_s7 = int_to_ptr.vmem [resolvable:$true] %s14_s7 }
   0x3   :  { %s48_s8 = scalar_lea.vmem %s15_s7, 128  ;;  %p53_p1 = scmp.lt.s32.totalorder %s15_s7, %s15_s7 }
   0x4   :  { %p49_p0 = scmp.ne.s32.totalorder %s15_s7, %s48_s8  ;;  %p54_p2 = scmp.lt.s32.totalorder %s48_s8, %s48_s8 }
   0x6   :  { %p55_p3 = por %p54_p2, %p53_p1 }
   0x8   :  { %p56_p4 = pnand %p55_p3, %p49_p0 }
   0xa   :  { %59 = shalt.err (!%p56_p4)
}
   0xb   :  { %17 = dma.hbm_to_vmem [thread:$0]  %s102_s0, 128, %s15_s7, [#allocation3]  }
   0xc   :  { %80 = dma.done.wait [#allocation3], 128  }
   0xd   :  { %81 = vsyncadd [#allocation3], 4294967168  ;;  %s85_s11 = smov [#allocation5]   ;;  %v21_v0 = vld [vmem:[#allocation2] sm:$0xff] }
   0xe   :  { %s29_s12 = sshll.u32 %s85_s11, 4  ;;  %22 = vst [vmem:[#allocation5] sm:$0xff] %v21_v0  ;;  %s30_s12 = int_to_ptr.vmem [resolvable:$true] %s29_s12 }
   0xf   :  { %s60_s13 = scalar_lea.vmem %s30_s12, 128  ;;  %p65_p6 = scmp.lt.s32.totalorder %s30_s12, %s30_s12 }
  0x10   :  { %p61_p5 = scmp.ne.s32.totalorder %s30_s12, %s60_s13  ;;  %p66_p7 = scmp.lt.s32.totalorder %s60_s13, %s60_s13 }
  0x12   :  { %p67_p8 = por %p66_p7, %p65_p6 }
  0x14   :  { %p68_p9 = pnand %p67_p8, %p61_p5 }
  0x16   :  { %71 = shalt.err (!%p68_p9)
}
  0x17   :  { %32 = dma.vmem_to_hbm [thread:$0]  %s30_s12, 128, %s103_s1, [#allocation4]  }
  0x18   :  { %82 = dma.done.wait [#allocation4], 128  }
  0x19   :  { %83 = vsyncadd [#allocation4], 4294967168 }
  0x1a   :  { %36 = vsyncpa [#allocation3], 1 }
  0x1b   :  { %37 = vsyncpa [#allocation4], 1 }

// kernel: tpu_custom_call.1
= control target key start
LH: loop header
LB: loop body
LE: loop exit
PB: predicated region body
PF: predicated region fallthrough
CT: control target
= control target key end

     0   :  { %8 = vsyncpa [#allocation5], 0  ;;  %s2716_s0 = inlined_call_operand.vmem [shape: f32[2,8,8,32], index: 0, kind: input, shape index: {}]   ;;  %s2717_s1 = inlined_call_operand.vmem [shape: bf16[288,64], index: 1, kind: input, shape index: {}]   ;;  %s2718_s2 = inlined_call_operand.vmem [shape: f32[1,64], index: 2, kind: input, shape index: {}]   ;;  %s2719_s3 = inlined_call_operand.hbm [shape: f32[2,8,8,64], index: 3, kind: output, shape index: {}]  }
   0x1   :  { %10 = vsyncpa [#allocation5 + $0x1], 0  ;;  %s2056_s12 = smov 0   ;;  %s2058_s13 = smov 0  }
   0x2   :  { %s2060_s14 = smov 0   ;;  %s2062_s15 = smov 0  }
   0x3 LB: > { %s2077_s16 = sadd.s32 4294967295, %s2027_s15   ;;  %s1726_s17 = sadd.s32 4294967294, %s2027_s15   ;;  %s2027_s15 = sphi %s2062_s15, %s2735_s15   ;;  %s2023_s14 = sphi %s2060_s14, %s2734_s14   ;;  %s2019_s13 = sphi %s2058_s13, %s2733_s13   ;;  %s2015_s12 = sphi %s2056_s12, %s2732_s12  }
   0x4   : > { %s2081_s18 = sadd.s32 1, %s2027_s15   ;;  %s91_s19 = sadd.s32 1, %s2023_s14 }
   0x5   : > { %s88_s20 = ssub.s32 %s2027_s15, %s2081_s18  ;;  %p101_p0 = scmp.ne.s32.totalorder %s2023_s14, %s2019_s13 }
   0x6   : > { %p89_p1 = scmp.eq.s32.totalorder %s88_s20, 0  ;;  %p102_p2 = scmp.eq.s32.totalorder %s2077_s16, 1 }
   0x7   : > { %p107_p3 = scmp.ne.s32.totalorder %s2019_s13, %s2015_s12  ;;  %p108_p4 = scmp.eq.s32.totalorder %s1726_s17, 1 }
   0x8   : > { %s2092_s21 = scalar_select %p89_p1, %s2023_s14, %s91_s19  }
   0x9   : > { %p2094_p5 = por %p102_p2, %p101_p0  ;;  %p2098_p6 = por %p108_p4, %p107_p3 }
   0xa   : > { %p1729_p7 = scmp.ge.s32.totalorder %s2027_s15, 1  ;;  %p140_p8 = scmp.lt.s32.totalorder %s2027_s15, 3 }
   0xc   : > { %p141_p9 = pnand %p1729_p7, %p140_p8 }
   0xd   : > { %p164_p10 = scmp.lt.s32.totalorder (!%p141_p9), %s2077_s16, 1  ;;  %s2030_s6 = smov (!%p141_p9), 64  }
   0xe   : > { %144 = sbr.rel (%p141_p9) target bundleno = 487 (0x1e7), region = 32  ;;  %s2031_s11 = smov (!%p141_p9), 96  }
   0xf   : > { %s2032_s17 = smov (!%p141_p9), 32   ;;  %s1814_s20 = sshll.u32 (!%p141_p9), %s2077_s16, 10 }
  0x10   : > { %s2668_s27 = scalar_lea.hbm (!%p141_p9), %s2719_s3, %s1814_s20  ;;  %s2033_s29 = smov (!%p141_p9), [#allocation4]  }
  0x11   : > { %s1971_s30 = sshll.u32 (!%p141_p9), %s2033_s29, 4  ;;  %s1972_s30 = int_to_ptr.vmem [resolvable:$false] %s1971_s30 }
  0x12   : > { %s1973_s4 = scalar_lea.vmem (!%p141_p9), %s1972_s30, 2048 }
  0x13   : > { %vm178_vm0 = vcmask 257024   ;;  %vm180_vm1 = vcmask 253952   ;;  %vm186_vm2 = vsmask.f32 256  ;;  %v2029_v0 = vmov 0   ;;  %s165_s24 = scalar_select %p164_p10, %s2077_s16, 1 }
  0x14   : > { %179 = vst.msk [vmem:[#allocation2] sm:$0xf] %vm178_vm0, %v2029_v0  ;;  %vm2107_vm3 = vmand %vm180_vm1, %vm186_vm2  ;;  %vm218_vm4 = vsmask.f32 7938  ;;  %v197_v2 = vld [vmem:[#allocation2 + $0x18] sm:$0x1] }
  0x15   : > { %181 = vst.msk [vmem:[#allocation2 + $0x4] sm:$0x1] %vm180_vm1, %v2029_v0  ;;  %184 = vst.msk [vmem:[#allocation2 + $0x4c] sm:$0x1] %vm180_vm1, %v2029_v0  ;;  %v194_v3 = vld [vmem:[#allocation2 + $0x10] sm:$0x1] }
  0x16   : > { %183 = vst.msk [vmem:[#allocation2 + $0x48] sm:$0xf] %vm178_vm0, %v2029_v0  ;;  %v198_v4 = vsel %vm2107_vm3, 0, %v197_v2  ;;  %v195_v5 = vsel %vm2107_vm3, 0, %v194_v3  ;;  %v191_v6 = vld [vmem:[#allocation2 + $0x8] sm:$0x1]  ;;  %vm2121_vm5 = vmand %vm180_vm1, %vm218_vm4 }
  0x17   : > { %199 = vst [vmem:[#allocation2 + $0x18] sm:$0x1] %v198_v4  ;;  %196 = vst [vmem:[#allocation2 + $0x10] sm:$0x1] %v195_v5  ;;  %v192_v8 = vsel %vm2107_vm3, 0, %v191_v6  ;;  %s1805_s25 = sshll.u32 %s165_s24, 6 }
  0x18   : > { %v223_v9 = vld [vmem:[#allocation2 + $0xc] sm:$0x1]  ;;  %193 = vst [vmem:[#allocation2 + $0x8] sm:$0x1] %v192_v8  ;;  %v226_v11 = vld [vmem:[#allocation2 + $0x14] sm:$0x1]  ;;  %s2132_s28 = scalar_lea.vmem %s2716_s0, %s1805_s25  ;;  %vm2159_vm8 = vmand %vm178_vm0, %vm218_vm4 }
  0x19   : > { %v224_v10 = vsel %vm2121_vm5, 0, %v223_v9  ;;  %v227_v12 = vsel %vm2121_vm5, 0, %v226_v11  ;;  %v209_v13 = vld [vmem:[#allocation2 + $0x38] sm:$0x1]  ;;  %v241_v14 = vld [vmem:[#allocation2 + $0x3c] sm:$0x1] }
  0x1a   : > { %225 = vst [vmem:[#allocation2 + $0xc] sm:$0x1] %v224_v10  ;;  %v172_v15 = vld [vmem:[%s2132_s28 + $0x10] sm:$0xff]  ;;  %v171_v16 = vld [vmem:[%s2132_s28 + $0x8] sm:$0xff]  ;;  %v170_v17 = vld [vmem:[%s2132_s28] sm:$0xff]  ;;  %v210_v18 = vsel %vm2107_vm3, 0, %v209_v13 }
  0x1b   : > { %228 = vst [vmem:[#allocation2 + $0x14] sm:$0x1] %v227_v12  ;;  %v242_v19 = vsel %vm2121_vm5, 0, %v241_v14  ;;  %vm625_vm6 = vcmask 1042432   ;;  %v1808_v21 = vpack.c.bf16 %v172_v15, %v172_v15  ;;  %v1807_v22 = vpack.c.bf16 %v171_v16, %v171_v16  ;;  %v188_v24 = vld [vmem:[#allocation2] sm:$0x1] }
  0x1c   : > { %v220_v20 = vld [vmem:[#allocation2 + $0x4] sm:$0x1]  ;;  %v1806_v23 = vpack.c.bf16 %v170_v17, %v170_v17  ;;  %211 = vst [vmem:[#allocation2 + $0x38] sm:$0x1] %v210_v18  ;;  %243 = vst [vmem:[#allocation2 + $0x3c] sm:$0x1] %v242_v19 }
  0x1d   : > { %v221_v25 = vsel %vm2121_vm5, 0, %v220_v20  ;;  %v2145_v26 = vld [vmem:[#allocation2] sm:$0xe]  ;;  %v189_v27 = vsel %vm2107_vm3, 0, %v188_v24  ;;  %v176_v28 = vld [vmem:[%s2132_s28 + $0x30] sm:$0xff]  ;;  %v175_v29 = vld [vmem:[%s2132_s28 + $0x28] sm:$0xff] }
  0x1e   : > { %222 = vst [vmem:[#allocation2 + $0x4] sm:$0x1] %v221_v25  ;;  %v299_v30 = vshrl.u32 %v1808_v21, 16  ;;  %v302_v31 = vshll.u32 %v1808_v21, 16  ;;  %v291_v32 = vshrl.u32 %v1807_v22, 16  ;;  %v294_v33 = vshll.u32 %v1807_v22, 16 }
  0x1f   : > { %190 = vst [vmem:[#allocation2] sm:$0x1] %v189_v27  ;;  %v206_v34 = vld [vmem:[#allocation2 + $0x30] sm:$0x1]  ;;  %v377_v35 = vld [vmem:[#allocation2 + $0x18] sm:$0xf]  ;;  %v1812_v39 = vpack.c.bf16 %v176_v28, %v176_v28  ;;  %v2151_v40 = vpack.c.bf16 %v175_v29, %v175_v29 }
  0x20   : > { %v371_v36 = vld [vmem:[#allocation2 + $0x10] sm:$0xf]  ;;  %v283_v37 = vshrl.u32 %v1806_v23, 16  ;;  %v286_v38 = vshll.u32 %v1806_v23, 16  ;;  %vm626_vm7 = vcmask 1046532   ;;  %v2153_v41 = vrot.slane %v299_v30, 7 }
  0x21   : > { %v293_v42 = vrot.slane %v291_v32, 7  ;;  %v365_v43 = vld [vmem:[#allocation2 + $0x8] sm:$0xf]  ;;  %v207_v44 = vsel %vm2107_vm3, 0, %v206_v34  ;;  %v1741_v46 = vrot.slane %v2145_v26, 9  ;;  %v331_v49 = vshrl.u32 %v1812_v39, 16  ;;  %vm2169_vm9 = vmor %vm625_vm6, %vm626_vm7 }
  0x22   : > { %v285_v47 = vrot.slane %v283_v37, 7  ;;  %v368_v48 = vld [vmem:[#allocation2 + $0xc] sm:$0x1]  ;;  %v334_v50 = vshll.u32 %v1812_v39, 16  ;;  %208 = vst [vmem:[#allocation2 + $0x30] sm:$0x1] %v207_v44  ;;  %v304_v51 = vor.u32 %v302_v31, %v2153_v41 }
  0x23   : > { %v296_v52 = vor.u32 %v294_v33, %v293_v42  ;;  %v297_v53 = vrot.slane %v293_v42, 4  ;;  %v374_v54 = vld [vmem:[#allocation2 + $0x14] sm:$0x1]  ;;  %v177_v56 = vld [vmem:[%s2132_s28 + $0x38] sm:$0xff]  ;;  %v333_v59 = vrot.slane %v331_v49, 7  ;;  %v323_v61 = vshrl.u32 %v2151_v40, 16 }
  0x24   : > { %v238_v55 = vld [vmem:[#allocation2 + $0x34] sm:$0x1]  ;;  %v288_v57 = vor.u32 %v286_v38, %v285_v47  ;;  %v289_v58 = vrot.slane %v285_v47, 4  ;;  %v401_v60 = vld [vmem:[#allocation2 + $0x38] sm:$0xf]  ;;  %v378_v63 = vsel %vm2159_vm8, %v304_v51, %v377_v35  ;;  %v2185_v14 = vpack.c.bf16 %v177_v56, %v177_v56 }
  0x25   : > { %v372_v0 = vsel %vm2159_vm8, %v296_v52, %v371_v36  ;;  %vm445_vm10 = vsmask.f32 3328  ;;  %vm446_vm11 = vsmask.f32 7440  ;;  %v375_v2 = vsel %vm2107_vm3, %v297_v53, %v374_v54  ;;  %v404_v3 = vld [vmem:[#allocation2 + $0x3c] sm:$0x1] }
  0x26   : > { %v239_v4 = vsel %vm2121_vm5, 0, %v238_v55  ;;  %v212_v5 = vld [vmem:[#allocation2 + $0x40] sm:$0x1]  ;;  %v594_v6 = vld [vmem:[#allocation2 + $0x4] sm:$0x1]  ;;  %v366_v8 = vsel %vm2159_vm8, %v288_v57, %v365_v43  ;;  %v369_v9 = vsel %vm2107_vm3, %v289_v58, %v368_v48  ;;  %v336_v12 = vor.u32 %v334_v50, %v333_v59  ;;  %v1934_v25 = vld [vmem:[%s2717_s1 + $0x78] sm:$0xff]  }
  0x27   : > { %379 = vst [vmem:[#allocation2 + $0x18] sm:$0xf] %v378_v63  ;;  %373 = vst [vmem:[#allocation2 + $0x10] sm:$0xf] %v372_v0  ;;  %v429_v10 = vld [vmem:[#allocation2] sm:$0xf]  ;;  %1815 = vmatprep.subr.bf16.mxu0 %v1934_v25  ;;  %1873 = vmatprep.subr.bf16.mxu1 %v1934_v25 }
  0x28   : > { %v430_v11 = vld [vmem:[#allocation2 + $0x4] sm:$0x1]  ;;  %376 = vst [vmem:[#allocation2 + $0x14] sm:$0x1] %v375_v2  ;;  %240 = vst [vmem:[#allocation2 + $0x34] sm:$0x1] %v239_v4  ;;  %v402_v21 = vsel %vm2159_vm8, %v336_v12, %v401_v60 }
  0x29   : > { %v244_v13 = vld [vmem:[#allocation2 + $0x44] sm:$0x1]  ;;  %v630_v15 = vrot.slane %v594_v6, 5  ;;  %367 = vst [vmem:[#allocation2 + $0x8] sm:$0xf] %v366_v8  ;;  %v449_v16 = vshrl.u32 %v429_v10, 16  ;;  %vm2232_vm12 = vmor %vm445_vm10, %vm446_vm11 }
  0x2a   : > { %370 = vst [vmem:[#allocation2 + $0xc] sm:$0x1] %v369_v9  ;;  %v452_v17 = vshll.u32 %v429_v10, 16  ;;  %v458_v18 = vshll.u32 %v430_v11, 16  ;;  %v229_v19 = vld [vmem:[#allocation2 + $0x1c] sm:$0x1] }
  0x2b   : > { %v337_v20 = vrot.slane %v333_v59, 4  ;;  %v2189_v22 = vrot.slane %v323_v61, 7  ;;  %v326_v23 = vshll.u32 %v2151_v40, 16  ;;  %v215_v24 = vld [vmem:[#allocation2 + $0x48] sm:$0x1]  ;;  %v631_v26 = vsel %vm2169_vm9, %v1741_v46, %v630_v15  ;;  %v1935_v31 = vld [vmem:[%s2717_s1 + $0x38] sm:$0xff]  }
  0x2c   : > { %v451_v27 = vrot.slane %v449_v16, 4  ;;  %v454_v28 = vrot.slane %v452_v17, 5  ;;  %v2197_v29 = vrot.slane %v458_v18, 5  ;;  %403 = vst [vmem:[#allocation2 + $0x38] sm:$0xf] %v402_v21  ;;  %660 = vrot.lane.b32.xlu0 %v631_v26, %s2030_s6  ;;  %v213_v35 = vsel %vm2107_vm3, 0, %v212_v5  ;;  %1816 = vmatpush3.bf16.msra.mxu0 %v1935_v31 }
  0x2d   : > { %v395_v30 = vld [vmem:[#allocation2 + $0x30] sm:$0xf]  ;;  %v405_v32 = vsel %vm2107_vm3, %v337_v20, %v404_v3  ;;  %v328_v33 = vor.u32 %v326_v23, %v2189_v22  ;;  %v329_v34 = vrot.slane %v2189_v22, 4  ;;  %v247_v36 = vld [vmem:[#allocation2 + $0x4c] sm:$0x1]  ;;  %v245_v38 = vsel %vm2121_vm5, 0, %v244_v13  ;;  %1881 = vmatpush3.bf16.msra.mxu1 %v1935_v31 }
  0x2e   : > { %v455_v37 = vor.u32 %v454_v28, %v451_v27  ;;  %406 = vst [vmem:[#allocation2 + $0x3c] sm:$0x1] %v405_v32  ;;  %214 = vst [vmem:[#allocation2 + $0x40] sm:$0x1] %v213_v35  ;;  %v339_v39 = vshrl.u32 %v2185_v14, 16  ;;  %v342_v40 = vshll.u32 %v2185_v14, 16 }
  0x2f   : > { %v1936_v42 = vld [vmem:[%s2717_s1 + $0x70] sm:$0xff]   ;;  %v396_v43 = vsel %vm2159_vm8, %v328_v33, %v395_v30  ;;  %246 = vst [vmem:[#allocation2 + $0x44] sm:$0x1] %v245_v38  ;;  %v230_v44 = vsel %vm2121_vm5, 0, %v229_v19  ;;  %v216_v46 = vsel %vm2107_vm3, 0, %v215_v24  ;;  %v248_v47 = vsel %vm2121_vm5, 0, %v247_v36 }
  0x30   : > { %v200_v48 = vld [vmem:[#allocation2 + $0x20] sm:$0x1]  ;;  %v1937_v49 = vld [vmem:[%s2717_s1 + $0x30] sm:$0xff]   ;;  %v984_v50 = vld [vmem:[#allocation2 + $0x18] sm:$0xf]  ;;  %1817 = vmatprep.subr.bf16.mxu0 %v1936_v42  ;;  %1874 = vmatprep.subr.bf16.mxu1 %v1936_v42  ;;  %v456_v58 = vrot.slane %v455_v37, 4 }
  0x31   : > { %v983_v51 = vld [vmem:[#allocation2 + $0x10] sm:$0xf]  ;;  %397 = vst [vmem:[#allocation2 + $0x30] sm:$0xf] %v396_v43  ;;  %231 = vst [vmem:[#allocation2 + $0x1c] sm:$0x1] %v230_v44  ;;  %1001 = vrot.lane.b32.xlu1 %v984_v50, %s2030_s6  ;;  %1818 = vmatpush3.bf16.msra.mxu0 %v1937_v49 }
  0x32   : > { %v694_v52 = vld [vmem:[#allocation2 + $0x10] sm:$0xf]  ;;  %217 = vst [vmem:[#allocation2 + $0x48] sm:$0x1] %v216_v46  ;;  %249 = vst [vmem:[#allocation2 + $0x4c] sm:$0x1] %v248_v47  ;;  %999 = vrot.lane.b32.xlu0 %v983_v51, %s2030_s6  ;;  %1882 = vmatpush3.bf16.msra.mxu1 %v1937_v49  ;;  %v461_v15 = vsel %vm2232_vm12, %v456_v58, %v2197_v29 }
  0x33   : > { %v693_v53 = vld [vmem:[#allocation2 + $0x8] sm:$0xf]  ;;  %v887_v55 = vld [vmem:[#allocation2 + $0xc] sm:$0x1]  ;;  %v888_v59 = vld [vmem:[#allocation2 + $0x10] sm:$0xe] }
  0x34   : > { %v886_v54 = vld [vmem:[#allocation2 + $0x8] sm:$0xe]  ;;  %v920_v57 = vrot.slane %v887_v55, 5  ;;  %v341_v60 = vrot.slane %v339_v39, 7  ;;  %v305_v61 = vrot.slane %v2153_v41, 4  ;;  %v201_v3 = vsel %vm2107_vm3, 0, %v200_v48 }
  0x35   : > { %v1749_v56 = vrot.slane %v886_v54, 9  ;;  %v889_v0 = vld [vmem:[#allocation2 + $0x14] sm:$0x1]  ;;  %v898_v2 = vld [vmem:[#allocation2 + $0x38] sm:$0xe]  ;;  %v1750_v4 = vrot.slane %v888_v59, 9  ;;  %711 = vrot.lane.b32.xlu1 %v694_v52, %s2031_s11 }
  0x36   : > { %v924_v5 = vrot.slane %v889_v0, 5  ;;  %v2238_v6 = vld [vmem:[#allocation2 + $0x8] sm:$0xe]  ;;  %v2240_v8 = vld [vmem:[#allocation2 + $0xc] sm:$0x1]  ;;  %709 = vrot.lane.b32.xlu0 %v693_v53, %s2031_s11  ;;  %v1755_v10 = vrot.slane %v898_v2, 9  ;;  %v344_v13 = vor.u32 %v342_v40, %v341_v60 }
  0x37   : > { %202 = vst [vmem:[#allocation2 + $0x20] sm:$0x1] %v201_v3  ;;  %v921_v41 = vsel %vm2169_vm9, %v1749_v56, %v920_v57  ;;  %v899_v9 = vld [vmem:[#allocation2 + $0x3c] sm:$0x1]  ;;  %v1742_v11 = vrot.slane %v2238_v6, 9  ;;  %v345_v18 = vrot.slane %v341_v60, 4 }
  0x38   : > { %v398_v12 = vld [vmem:[#allocation2 + $0x34] sm:$0x1]  ;;  %v232_v14 = vld [vmem:[#allocation2 + $0x24] sm:$0x1]  ;;  %v944_v16 = vrot.slane %v899_v9, 5  ;;  %v925_v26 = vsel %vm2169_vm9, %v1750_v4, %v924_v5  ;;  %v634_v27 = vrot.slane %v2240_v8, 5 }
  0x39   : > { %v399_v17 = vsel %vm2107_vm3, %v329_v34, %v398_v12  ;;  %v407_v19 = vld [vmem:[#allocation2 + $0x40] sm:$0xf]  ;;  %v410_v20 = vld [vmem:[#allocation2 + $0x44] sm:$0x1]  ;;  %v2254_v21 = vld [vmem:[#allocation2 + $0x30] sm:$0xe]  ;;  %950 = vrot.lane.b32.xlu1 %v921_v41, %s2032_s17 }
  0x3a   : > { %400 = vst [vmem:[#allocation2 + $0x34] sm:$0x1] %v399_v17  ;;  %v408_v23 = vsel %vm2159_vm8, %v344_v13, %v407_v19  ;;  %v431_v24 = vld [vmem:[#allocation2 + $0x8] sm:$0xf]  ;;  %v432_v25 = vld [vmem:[#allocation2 + $0xc] sm:$0x1]  ;;  %v411_v22 = vsel %vm2107_vm3, %v345_v18, %v410_v20  ;;  %560 = vrot.lane.b32.xlu0 %v461_v15, %s2032_s17  ;;  %v945_v30 = vsel %vm2169_vm9, %v1755_v10, %v944_v16 }
  0x3b   : > { %409 = vst [vmem:[#allocation2 + $0x40] sm:$0xf] %v408_v23  ;;  %v463_v28 = vshrl.u32 %v431_v24, 16  ;;  %v2263_v29 = vld [vmem:[#allocation2 + $0x38] sm:$0xe]  ;;  %v1747_v31 = vrot.slane %v2254_v21, 9  ;;  %v635_v59 = vsel %vm2169_vm9, %v1742_v11, %v634_v27 }
  0x3c   : > { %412 = vst [vmem:[#allocation2 + $0x44] sm:$0x1] %v411_v22  ;;  %v466_v32 = vshll.u32 %v431_v24, 16  ;;  %v472_v33 = vshll.u32 %v432_v25, 16  ;;  %v1031_v34 = vld [vmem:[#allocation2 + $0x10] sm:$0xf] }
  0x3d   : > { %v465_v35 = vrot.slane %v463_v28, 4  ;;  %v1032_v36 = vld [vmem:[#allocation2 + $0x14] sm:$0x1]  ;;  %v1048_v37 = vshrl.u32 %v1031_v34, 16  ;;  %v1051_v38 = vshll.u32 %v1031_v34, 16  ;;  %v233_v39 = vsel %vm2121_vm5, 0, %v232_v14  ;;  %952 = vrot.lane.b32.xlu1 %v925_v26, %s2032_s17 }
  0x3e   : > { %v468_v40 = vrot.slane %v466_v32, 5  ;;  %v2272_v42 = vrot.slane %v472_v33, 5  ;;  %v2274_v43 = vld [vmem:[#allocation2 + $0x3c] sm:$0x1]  ;;  %v1748_v44 = vrot.slane %v2263_v29, 9  ;;  %v1938_v47 = vld [vmem:[%s2717_s1 + $0x68] sm:$0xff]   ;;  %962 = vrot.lane.b32.xlu0 %v945_v30, %s2032_s17 }
  0x3f   : > { %v380_v46 = vld [vmem:[#allocation2 + $0x1c] sm:$0x1]  ;;  %234 = vst [vmem:[#allocation2 + $0x24] sm:$0x1] %v233_v39  ;;  %v1050_v48 = vrot.slane %v1048_v37, 4  ;;  %v1053_v49 = vrot.slane %v1051_v38, 5  ;;  %1819 = vmatprep.subr.bf16.mxu0 %v1938_v47  ;;  %1875 = vmatprep.subr.bf16.mxu1 %v1938_v47 }
  0x40   : > { %v381_v50 = vsel %vm2107_vm3, %v305_v61, %v380_v46  ;;  %v1033_v51 = vld [vmem:[#allocation2 + $0x18] sm:$0xf]  ;;  %v441_v52 = vld [vmem:[#allocation2 + $0x30] sm:$0xf]  ;;  %v469_v53 = vor.u32 %v468_v40, %v465_v35  ;;  %v1057_v54 = vshll.u32 %v1032_v36, 16  ;;  %v1939_v58 = vld [vmem:[%s2717_s1 + $0x28] sm:$0xff]  }
  0x41   : > { %382 = vst [vmem:[#allocation2 + $0x1c] sm:$0x1] %v381_v50  ;;  %v1062_v55 = vshrl.u32 %v1033_v51, 16  ;;  %v1065_v56 = vshll.u32 %v1033_v51, 16  ;;  %v443_v57 = vld [vmem:[#allocation2 + $0x38] sm:$0xf]  ;;  %v1054_v61 = vor.u32 %v1053_v49, %v1050_v48  ;;  %1820 = vmatpush3.bf16.msra.mxu0 %v1939_v58  ;;  %1883 = vmatpush3.bf16.msra.mxu1 %v1939_v58 }
  0x42   : > { %v606_v60 = vld [vmem:[#allocation2 + $0x34] sm:$0x1]  ;;  %v533_v2 = vshrl.u32 %v441_v52, 16  ;;  %v536_v3 = vshll.u32 %v441_v52, 16  ;;  %v900_v5 = vld [vmem:[#allocation2 + $0x40] sm:$0xe]  ;;  %662 = vrot.lane.b32.xlu1 %v635_v59, %s2030_s6 }
  0x43   : > { %v442_v0 = vld [vmem:[#allocation2 + $0x34] sm:$0x1]  ;;  %v654_v4 = vrot.slane %v606_v60, 5  ;;  %v470_v6 = vrot.slane %v469_v53, 4  ;;  %v1064_v8 = vrot.slane %v1062_v55, 4  ;;  %v1067_v41 = vrot.slane %v1065_v56, 5 }
  0x44   : > { %v173_v9 = vld [vmem:[%s2132_s28 + $0x18] sm:$0xff]  ;;  %v901_v10 = vld [vmem:[#allocation2 + $0x44] sm:$0x1]  ;;  %v1756_v12 = vrot.slane %v900_v5, 9  ;;  %v658_v13 = vrot.slane %v2274_v43, 5  ;;  %v535_v11 = vrot.slane %v533_v2, 4 }
  0x45   : > { %v538_v14 = vrot.slane %v536_v3, 5  ;;  %v655_v15 = vsel %vm2169_vm9, %v1747_v31, %v654_v4  ;;  %v948_v16 = vrot.slane %v901_v10, 5  ;;  %v1055_v17 = vrot.slane %v1054_v61, 4  ;;  %v444_v19 = vld [vmem:[#allocation2 + $0x3c] sm:$0x1]  ;;  %v1940_v20 = vld [vmem:[%s2717_s1 + $0x60] sm:$0xff]  }
  0x46   : > { %v1059_v18 = vrot.slane %v1057_v54, 5  ;;  %672 = vrot.lane.b32.xlu0 %v655_v15, %s2030_s6  ;;  %v1068_v21 = vor.u32 %v1067_v41, %v1064_v8  ;;  %v547_v24 = vshrl.u32 %v443_v57, 16  ;;  %v475_v26 = vsel %vm2232_vm12, %v470_v6, %v2272_v42  ;;  %1821 = vmatprep.subr.bf16.mxu0 %v1940_v20  ;;  %v1941_v28 = vld [vmem:[%s2717_s1 + $0x20] sm:$0xff]   ;;  %v1045_v46 = vld [vmem:[#allocation2 + $0x48] sm:$0xf]  ;;  %v1943_v58 = vld [vmem:[%s2717_s1 + $0x18] sm:$0xff]  }
  0x47   : > { %v539_v23 = vor.u32 %v538_v14, %v535_v11  ;;  %v949_v25 = vsel %vm2169_vm9, %v1756_v12, %v948_v16  ;;  %v542_v27 = vshll.u32 %v442_v0, 16  ;;  %v550_v22 = vshll.u32 %v443_v57, 16  ;;  %1876 = vmatprep.subr.bf16.mxu1 %v1940_v20  ;;  %v1043_v38 = vld [vmem:[#allocation2 + $0x40] sm:$0xf]  ;;  %1822 = vmatpush3.bf16.msra.mxu0 %v1941_v28  ;;  %v1044_v51 = vld [vmem:[#allocation2 + $0x44] sm:$0x1] }
  0x48   : > { %v1034_v30 = vld [vmem:[#allocation2 + $0x1c] sm:$0x1]  ;;  %v549_v31 = vrot.slane %v547_v24, 4  ;;  %v556_v32 = vshll.u32 %v444_v19, 16  ;;  %v2306_v33 = vpack.c.bf16 %v173_v9, %v173_v9  ;;  %964 = vrot.lane.b32.xlu1 %v949_v25, %s2032_s17  ;;  %v659_v34 = vsel %vm2169_vm9, %v1748_v44, %v658_v13  ;;  %1884 = vmatpush3.bf16.msra.mxu1 %v1941_v28  ;;  %v433_v53 = vld [vmem:[#allocation2 + $0x10] sm:$0xf] }
  0x49   : > { %v1060_v35 = vsel %vm2232_vm12, %v1055_v17, %v1059_v18  ;;  %v1071_v36 = vshll.u32 %v1034_v30, 16  ;;  %v552_v37 = vrot.slane %v550_v22, 5  ;;  %v1069_v39 = vrot.slane %v1068_v21, 4  ;;  %v1942_v44 = vld [vmem:[%s2717_s1 + $0x58] sm:$0xff]   ;;  %v1046_v57 = vld [vmem:[#allocation2 + $0x4c] sm:$0x1] }
  0x4a   : > { %562 = vrot.lane.b32.xlu0 %v475_v26, %s2032_s17  ;;  %v540_v40 = vrot.slane %v539_v23, 4  ;;  %v1132_v42 = vshrl.u32 %v1043_v38, 16  ;;  %v1135_v43 = vshll.u32 %v1043_v38, 16  ;;  %v544_v29 = vrot.slane %v542_v27, 5  ;;  %1823 = vmatprep.subr.bf16.mxu0 %v1942_v44  ;;  %v435_v2 = vld [vmem:[#allocation2 + $0x18] sm:$0xf] }
  0x4b   : > { %v1073_v47 = vrot.slane %v1071_v36, 5  ;;  %v553_v48 = vor.u32 %v552_v37, %v549_v31  ;;  %v1146_v49 = vshrl.u32 %v1045_v46, 16  ;;  %v558_v50 = vrot.slane %v556_v32, 5  ;;  %v1944_v3 = vld [vmem:[%s2717_s1 + $0x50] sm:$0xff]   ;;  %1877 = vmatprep.subr.bf16.mxu1 %v1942_v44  ;;  %1824 = vmatpush3.bf16.msra.mxu0 %v1943_v58  ;;  %v1946_v13 = vld [vmem:[%s2717_s1 + $0x48] sm:$0xff]   ;;  %v174_v18 = vld [vmem:[%s2132_s28 + $0x20] sm:$0xff] }
  0x4c   : > { %v1149_v52 = vshll.u32 %v1045_v46, 16  ;;  %674 = vrot.lane.b32.xlu1 %v659_v34, %s2030_s6  ;;  %v1134_v55 = vrot.slane %v1132_v42, 4  ;;  %v1137_v56 = vrot.slane %v1135_v43, 5  ;;  %v477_v0 = vshrl.u32 %v433_v53, 16  ;;  %v434_v5 = vld [vmem:[#allocation2 + $0x14] sm:$0x1]  ;;  %1885 = vmatpush3.bf16.msra.mxu1 %v1943_v58 }
  0x4d   : > { %v554_v54 = vrot.slane %v553_v48, 4  ;;  %v1074_v59 = vsel %vm2232_vm12, %v1069_v39, %v1073_v47  ;;  %v1148_v60 = vrot.slane %v1146_v49, 4  ;;  %v545_v4 = vsel %vm2232_vm12, %v540_v40, %v544_v29  ;;  %v1945_v9 = vld [vmem:[%s2717_s1 + $0x10] sm:$0xff]   ;;  %1825 = vmatprep.subr.bf16.mxu0 %v1944_v3  ;;  %1878 = vmatprep.subr.bf16.mxu1 %v1944_v3  ;;  %v989_v14 = vld [vmem:[#allocation2 + $0x40] sm:$0xf]  ;;  %v1947_v30 = vld [vmem:[%s2717_s1 + $0x8] sm:$0xff]  }
  0x4e   : > { %1159 = vrot.lane.b32.xlu0 %v1060_v35, %s2031_s11  ;;  %v1151_v61 = vrot.slane %v1149_v52, 5  ;;  %v480_v6 = vshll.u32 %v433_v53, 16  ;;  %v491_v8 = vshrl.u32 %v435_v2, 16  ;;  %v307_v41 = vshrl.u32 %v2306_v33, 16  ;;  %v436_v24 = vld [vmem:[#allocation2 + $0x1c] sm:$0x1] }
  0x4f   : > { %v1141_v10 = vshll.u32 %v1044_v51, 16  ;;  %v494_v12 = vshll.u32 %v435_v2, 16  ;;  %v559_v11 = vsel %vm2232_vm12, %v554_v54, %v558_v50  ;;  %v1138_v15 = vor.u32 %v1137_v56, %v1134_v55  ;;  %v2344_v27 = vld [vmem:[#allocation2 + $0x18] sm:$0xe]  ;;  %v203_v28 = vld [vmem:[#allocation2 + $0x28] sm:$0x1]  ;;  %1826 = vmatpush3.bf16.msra.mxu0 %v1945_v9 }
  0x50   : > { %1161 = vrot.lane.b32.xlu1 %v1074_v59, %s2031_s11  ;;  %v1155_v16 = vshll.u32 %v1046_v57, 16  ;;  %v310_v17 = vshll.u32 %v2306_v33, 16  ;;  %v1152_v19 = vor.u32 %v1151_v61, %v1148_v60  ;;  %v479_v20 = vrot.slane %v477_v0, 4  ;;  %1886 = vmatpush3.bf16.msra.mxu1 %v1945_v9  ;;  %v383_v32 = vld [vmem:[#allocation2 + $0x20] sm:$0xf] }
  0x51   : > { %v482_v21 = vrot.slane %v480_v6, 5  ;;  %v486_v23 = vshll.u32 %v434_v5, 16  ;;  %v493_v25 = vrot.slane %v491_v8, 4  ;;  %v496_v26 = vrot.slane %v494_v12, 5  ;;  %v386_v33 = vld [vmem:[#allocation2 + $0x24] sm:$0x1]  ;;  %1827 = vmatprep.subr.bf16.mxu0 %v1946_v13  ;;  %1879 = vmatprep.subr.bf16.mxu1 %v1946_v13 }
  0x52   : > { %572 = vrot.lane.b32.xlu0 %v545_v4, %s2032_s17  ;;  %v309_v22 = vrot.slane %v307_v41, 7  ;;  %v2349_v31 = vrot.slane %v1141_v10, 5  ;;  %v1810_v34 = vpack.c.bf16 %v174_v18, %v174_v18  ;;  %v1948_v35 = vld [vmem:[%s2717_s1 + $0x40] sm:$0xff]   ;;  %v990_v36 = vld [vmem:[#allocation2 + $0x48] sm:$0xf]  ;;  %v1139_v37 = vrot.slane %v1138_v15, 4 }
  0x53   : > { %v2355_v38 = vrot.slane %v1155_v16, 5  ;;  %v2358_v42 = vrot.slane %v1152_v19, 4  ;;  %v483_v43 = vor.u32 %v482_v21, %v479_v20  ;;  %v2360_v46 = vrot.slane %v486_v23, 5  ;;  %v235_v29 = vld [vmem:[#allocation2 + $0x2c] sm:$0x1]  ;;  %1828 = vmatpush3.bf16.msra.mxu0 %v1947_v30  ;;  %v1949_v53 = vld [vmem:[%s2717_s1] sm:$0xff]  }
  0x54   : > { %574 = vrot.lane.b32.xlu1 %v559_v11, %s2032_s17  ;;  %v312_v39 = vor.u32 %v310_v17, %v309_v22  ;;  %v313_v40 = vrot.slane %v309_v22, 4  ;;  %v500_v47 = vshll.u32 %v436_v24, 16  ;;  %v699_v48 = vld [vmem:[#allocation2 + $0x38] sm:$0xf]  ;;  %v497_v49 = vor.u32 %v496_v26, %v493_v25  ;;  %v891_v44 = vld [vmem:[#allocation2 + $0x1c] sm:$0x1]  ;;  %1887 = vmatpush3.bf16.msra.mxu1 %v1947_v30 }
  0x55   : > { %v1751_v50 = vrot.slane %v2344_v27, 9  ;;  %v700_v54 = vld [vmem:[#allocation2 + $0x40] sm:$0xf]  ;;  %v2370_v55 = vld [vmem:[#allocation2 + $0x10] sm:$0xe]  ;;  %v204_v57 = vsel %vm2107_vm3, 0, %v203_v28  ;;  %1829 = vmatprep.subr.bf16.mxu0 %v1948_v35  ;;  %1880 = vmatprep.subr.bf16.mxu1 %v1948_v35  ;;  %v1144_v8 = vsel %vm2232_vm12, %v1139_v37, %v2349_v31  ;;  %v1158_v15 = vsel %vm2232_vm12, %v2358_v42, %v2355_v38 }
  0x56   : > { %1011 = vrot.lane.b32.xlu0 %v989_v14, %s2030_s6  ;;  %v384_v51 = vsel %vm2159_vm8, %v312_v39, %v383_v32  ;;  %v387_v52 = vsel %vm2107_vm3, %v313_v40, %v386_v33  ;;  %v2372_v56 = vld [vmem:[#allocation2 + $0x14] sm:$0x1]  ;;  %v315_v58 = vshrl.u32 %v1810_v34, 16  ;;  %v2377_v59 = vld [vmem:[#allocation2 + $0x18] sm:$0xe]  ;;  %v318_v61 = vshll.u32 %v1810_v34, 16 }
  0x57   : > { %385 = vst [vmem:[#allocation2 + $0x20] sm:$0xf] %v384_v51  ;;  %388 = vst [vmem:[#allocation2 + $0x24] sm:$0x1] %v387_v52  ;;  %v2379_v60 = vld [vmem:[#allocation2 + $0x1c] sm:$0x1]  ;;  %1830 = vmatpush3.bf16.msra.mxu0 %v1949_v53 }
  0x58   : > { %1013 = vrot.lane.b32.xlu1 %v990_v36, %s2030_s6  ;;  %205 = vst [vmem:[#allocation2 + $0x28] sm:$0x1] %v204_v57  ;;  %v236_v0 = vsel %vm2121_vm5, 0, %v235_v29  ;;  %v484_v2 = vrot.slane %v483_v43, 4  ;;  %v502_v3 = vrot.slane %v500_v47, 5  ;;  %v928_v4 = vrot.slane %v891_v44, 5  ;;  %1888 = vmatpush3.bf16.msra.mxu1 %v1949_v53 }
  0x59   : > { %v317_v5 = vrot.slane %v315_v58, 7  ;;  %237 = vst [vmem:[#allocation2 + $0x2c] sm:$0x1] %v236_v0  ;;  %v1039_v6 = vld [vmem:[#allocation2 + $0x30] sm:$0xf]  ;;  %v498_v41 = vrot.slane %v497_v49, 4 }
  0x5a   : > { %721 = vrot.lane.b32.xlu0 %v699_v48, %s2031_s11  ;;  %v1743_v9 = vrot.slane %v2370_v55, 9  ;;  %v2388_v10 = vld [vmem:[#allocation2 + $0x30] sm:$0xe]  ;;  %v2390_v12 = vld [vmem:[#allocation2 + $0x34] sm:$0x1]  ;;  %v638_v7 = vrot.slane %v2372_v56, 5  ;;  %v489_v24 = vsel %vm2232_vm12, %v484_v2, %v2360_v46  ;;  %v929_v33 = vsel %vm2169_vm9, %v1751_v50, %v928_v4 }
  0x5b   : > { %v1744_v13 = vrot.slane %v2377_v59, 9  ;;  %v642_v11 = vrot.slane %v2379_v60, 5  ;;  %v1104_v14 = vshrl.u32 %v1039_v6, 16  ;;  %v320_v16 = vor.u32 %v318_v61, %v317_v5  ;;  %v2400_v17 = vld [vmem:[#allocation2 + $0x34] sm:$0x1]  ;;  %v2427_v46 = vld [vmem:[%s2717_s1 + $0x88] sm:$0xff]  }
  0x5c   : > { %723 = vrot.lane.b32.xlu1 %v700_v54, %s2031_s11  ;;  %v2402_v18 = vld [vmem:[#allocation2 + $0x38] sm:$0xf]  ;;  %v321_v19 = vrot.slane %v317_v5, 4  ;;  %v1754_v20 = vrot.slane %v2388_v10, 9  ;;  %v940_v21 = vrot.slane %v2390_v12, 5  ;;  %v1107_v23 = vshll.u32 %v1039_v6, 16  ;;  %1861 = vmatprep.subr.bf16.mxu1 %v2427_v46 }
  0x5d   : > { %v2410_v27 = vld [vmem:[#allocation2 + $0x3c] sm:$0x1]  ;;  %v2412_v30 = vrot.slane %v1104_v14, 4  ;;  %v1113_v31 = vshll.u32 %v2400_v17, 16  ;;  %v1118_v32 = vshrl.u32 %v2402_v18, 16  ;;  %v503_v38 = vsel %vm2232_vm12, %v498_v41, %v502_v3 }
  0x5e   : > { %1171 = vrot.lane.b32.xlu0 %v1144_v8, %s2031_s11  ;;  %v892_v25 = vld [vmem:[#allocation2 + $0x20] sm:$0xe]  ;;  %v893_v26 = vld [vmem:[#allocation2 + $0x24] sm:$0x1]  ;;  %v2431_v48 = vrot.slane %v1107_v23, 5  ;;  %v1121_v50 = vshll.u32 %v2402_v18, 16  ;;  %v639_v58 = vsel %vm2169_vm9, %v1743_v9, %v638_v7  ;;  %v643_v61 = vsel %vm2169_vm9, %v1744_v13, %v642_v11 }
  0x5f   : > { %v1752_v22 = vrot.slane %v892_v25, 9  ;;  %v389_v28 = vld [vmem:[#allocation2 + $0x28] sm:$0xf]  ;;  %v1035_v35 = vld [vmem:[#allocation2 + $0x20] sm:$0xf]  ;;  %v932_v39 = vrot.slane %v893_v26, 5 }
  0x60   : > { %1173 = vrot.lane.b32.xlu1 %v1158_v15, %s2031_s11  ;;  %v390_v34 = vsel %vm2159_vm8, %v320_v16, %v389_v28  ;;  %v1036_v36 = vld [vmem:[#allocation2 + $0x24] sm:$0x1]  ;;  %v392_v37 = vld [vmem:[#allocation2 + $0x2c] sm:$0x1]  ;;  %v1076_v40 = vshrl.u32 %v1035_v35, 16  ;;  %v1079_v42 = vshll.u32 %v1035_v35, 16  ;;  %v1110_v10 = vor.u32 %v2431_v48, %v2412_v30 }
  0x61   : > { %391 = vst [vmem:[#allocation2 + $0x28] sm:$0xf] %v390_v34  ;;  %v437_v43 = vld [vmem:[#allocation2 + $0x20] sm:$0xf]  ;;  %v393_v45 = vsel %vm2107_vm3, %v321_v19, %v392_v37  ;;  %v1085_v49 = vshll.u32 %v1036_v36, 16  ;;  %v2433_v44 = vrot.slane %v1118_v32, 4  ;;  %v933_v54 = vsel %vm2169_vm9, %v1752_v22, %v932_v39 }
  0x62   : > { %564 = vrot.lane.b32.xlu0 %v489_v24, %s2032_s17  ;;  %v505_v47 = vshrl.u32 %v437_v43, 16  ;;  %v508_v29 = vshll.u32 %v437_v43, 16  ;;  %394 = vst [vmem:[#allocation2 + $0x2c] sm:$0x1] %v393_v45  ;;  %v1127_v51 = vshll.u32 %v2410_v27, 16  ;;  %v1078_v52 = vrot.slane %v1076_v40, 4 }
  0x63   : > { %v1081_v53 = vrot.slane %v1079_v42, 5  ;;  %v438_v1 = vld [vmem:[#allocation2 + $0x24] sm:$0x1]  ;;  %v2442_v57 = vld [vmem:[#allocation2 + $0x20] sm:$0xe]  ;;  %v2452_v5 = vrot.slane %v1085_v49, 5 }
  0x64   : > { %566 = vrot.lane.b32.xlu1 %v503_v38, %s2032_s17  ;;  %v507_v55 = vrot.slane %v505_v47, 4  ;;  %v510_v56 = vrot.slane %v508_v29, 5  ;;  %v2446_v59 = vld [vmem:[#allocation2 + $0x24] sm:$0x1]  ;;  %v413_v60 = vld [vmem:[#allocation2] sm:$0xf] }
  0x65   : > { %v743_v0 = vld [vmem:[#allocation2 + $0xc] sm:$0x1]  ;;  %v742_v2 = vld [vmem:[#allocation2 + $0x8] sm:$0xf]  ;;  %421 = vst.msk [vmem:[#allocation3] sm:$0xf] %vm178_vm0, %v413_v60  ;;  %v1082_v4 = vor.u32 %v1081_v53, %v1078_v52 }
  0x66   : > { %954 = vrot.lane.b32.xlu0 %v929_v33, %s2032_s17  ;;  %v985_v3 = vld [vmem:[#allocation2 + $0x20] sm:$0xf]  ;;  %v514_v8 = vshll.u32 %v438_v1, 16  ;;  %v1745_v41 = vrot.slane %v2442_v57, 9  ;;  %v511_v14 = vor.u32 %v510_v56, %v507_v55  ;;  %v646_v11 = vrot.slane %v2446_v59, 5 }
  0x67   : > { %v768_v19 = vshll.u32 %v743_v0, 16  ;;  %v759_v23 = vshrl.u32 %v742_v2, 16  ;;  %v695_v28 = vld [vmem:[#allocation2 + $0x18] sm:$0xf]  ;;  %v1083_v32 = vrot.slane %v1082_v4, 4  ;;  %v2463_v40 = vrot.slane %v1121_v50, 5 }
  0x68   : > { %956 = vrot.lane.b32.xlu1 %v933_v54, %s2032_s17  ;;  %v1037_v6 = vld [vmem:[#allocation2 + $0x28] sm:$0xf]  ;;  %v516_v38 = vrot.slane %v514_v8, 5  ;;  %v512_v42 = vrot.slane %v511_v14, 4  ;;  %v744_v29 = vld [vmem:[#allocation2 + $0x10] sm:$0xf] }
  0x69   : > { %v1090_v9 = vshrl.u32 %v1037_v6, 16  ;;  %v1093_v7 = vshll.u32 %v1037_v6, 16  ;;  %v439_v13 = vld [vmem:[#allocation2 + $0x28] sm:$0xf]  ;;  %v1038_v15 = vld [vmem:[#allocation2 + $0x2c] sm:$0x1]  ;;  %v1088_v54 = vsel %vm2232_vm12, %v1083_v32, %v2452_v5 }
  0x6a   : > { %664 = vrot.lane.b32.xlu0 %v639_v58, %s2030_s6  ;;  %v519_v16 = vshrl.u32 %v439_v13, 16  ;;  %v522_v18 = vshll.u32 %v439_v13, 16  ;;  %v440_v26 = vld [vmem:[#allocation2 + $0x2c] sm:$0x1]  ;;  %v2457_v22 = vld [vmem:[#allocation2 + $0x28] sm:$0xe] }
  0x6b   : > { %v1092_v24 = vrot.slane %v1090_v9, 4  ;;  %v1095_v25 = vrot.slane %v1093_v7, 5  ;;  %v1099_v33 = vshll.u32 %v1038_v15, 16  ;;  %v986_v36 = vld [vmem:[#allocation2 + $0x28] sm:$0xf]  ;;  %v528_v43 = vshll.u32 %v440_v26, 16 }
  0x6c   : > { %666 = vrot.lane.b32.xlu1 %v643_v61, %s2030_s6  ;;  %v521_v34 = vrot.slane %v519_v16, 4  ;;  %v524_v35 = vrot.slane %v522_v18, 5  ;;  %v2461_v39 = vld [vmem:[#allocation2 + $0x2c] sm:$0x1]  ;;  %v1753_v45 = vrot.slane %v2457_v22, 9  ;;  %v770_v47 = vrot.slane %v768_v19, 5 }
  0x6d   : > { %v1096_v37 = vor.u32 %v1095_v25, %v1092_v24  ;;  %v696_v49 = vld [vmem:[#allocation2 + $0x20] sm:$0xf]  ;;  %v761_v52 = vrot.slane %v759_v23, 4  ;;  %v762_v53 = vshll.u32 %v742_v2, 16  ;;  %v745_v1 = vld [vmem:[#allocation2 + $0x14] sm:$0x1] }
  0x6e   : > { %1003 = vrot.lane.b32.xlu0 %v985_v3, %s2030_s6  ;;  %v1101_v55 = vrot.slane %v1099_v33, 5  ;;  %v525_v56 = vor.u32 %v524_v35, %v521_v34  ;;  %v936_v50 = vrot.slane %v2461_v39, 5  ;;  %v754_v58 = vld [vmem:[#allocation2 + $0x38] sm:$0xf]  ;;  %v773_v0 = vshrl.u32 %v744_v29, 16 }
  0x6f   : > { %v1097_v60 = vrot.slane %v1096_v37, 4  ;;  %v764_v61 = vrot.slane %v762_v53, 5  ;;  %v776_v3 = vshll.u32 %v744_v29, 16  ;;  %v755_v4 = vld [vmem:[#allocation2 + $0x3c] sm:$0x1]  ;;  %v530_v2 = vrot.slane %v528_v43, 5 }
  0x70   : > { %1005 = vrot.lane.b32.xlu1 %v986_v36, %s2030_s6  ;;  %v782_v6 = vshll.u32 %v745_v1, 16  ;;  %v843_v8 = vshrl.u32 %v754_v58, 16  ;;  %v846_v9 = vshll.u32 %v754_v58, 16  ;;  %v775_v14 = vrot.slane %v773_v0, 4  ;;  %v603_v24 = vld [vmem:[#allocation2 + $0x28] sm:$0xe] }
  0x71   : > { %v765_v7 = vor.u32 %v764_v61, %v761_v52  ;;  %v778_v13 = vrot.slane %v776_v3, 5  ;;  %v852_v5 = vshll.u32 %v755_v4, 16  ;;  %v526_v15 = vrot.slane %v525_v56, 4  ;;  %v756_v33 = vld [vmem:[#allocation2 + $0x40] sm:$0xf] }
  0x72   : > { %713 = vrot.lane.b32.xlu0 %v695_v28, %s2031_s11  ;;  %v784_v16 = vrot.slane %v782_v6, 5  ;;  %v845_v18 = vrot.slane %v843_v8, 4  ;;  %v848_v19 = vrot.slane %v846_v9, 5  ;;  %v1102_v23 = vsel %vm2232_vm12, %v1097_v60, %v1101_v55  ;;  %v757_v34 = vld [vmem:[#allocation2 + $0x44] sm:$0x1] }
  0x73   : > { %v766_v25 = vrot.slane %v765_v7, 4  ;;  %v779_v26 = vor.u32 %v778_v13, %v775_v14  ;;  %v854_v22 = vrot.slane %v852_v5, 5  ;;  %v517_v28 = vsel %vm2232_vm12, %v512_v42, %v516_v38  ;;  %v604_v43 = vld [vmem:[#allocation2 + $0x2c] sm:$0x1]  ;;  %v414_v52 = vld [vmem:[#allocation2 + $0x8] sm:$0xf] }
  0x74   : > { %715 = vrot.lane.b32.xlu1 %v696_v49, %s2031_s11  ;;  %v849_v32 = vor.u32 %v848_v19, %v845_v18  ;;  %v857_v37 = vshrl.u32 %v756_v33, 16  ;;  %v860_v39 = vshll.u32 %v756_v33, 16  ;;  %v866_v49 = vshll.u32 %v757_v34, 16  ;;  %422 = vst.msk [vmem:[#allocation3 + $0xc] sm:$0xf] %vm178_vm0, %v414_v52 }
  0x75   : > { %v771_v35 = vsel %vm2232_vm12, %v766_v25, %v770_v47  ;;  %v780_v36 = vrot.slane %v779_v26, 4  ;;  %v531_v38 = vsel %vm2232_vm12, %v526_v15, %v530_v2  ;;  %v937_v1 = vsel %vm2169_vm9, %v1753_v45, %v936_v50  ;;  %v419_v60 = vld [vmem:[#allocation2 + $0x30] sm:$0xf]  ;;  %v420_v0 = vld [vmem:[#allocation2 + $0x38] sm:$0xf] }
  0x76   : > { %1163 = vrot.lane.b32.xlu0 %v1088_v54, %s2031_s11  ;;  %878 = vst.msk [vmem:[#allocation3 + $0x4] sm:$0xf] %vm178_vm0, %v771_v35  ;;  %v850_v29 = vrot.slane %v849_v32, 4  ;;  %v859_v47 = vrot.slane %v857_v37, 4  ;;  %v862_v53 = vrot.slane %v860_v39, 5  ;;  %v1746_v54 = vrot.slane %v603_v24, 9 }
  0x77   : > { %v785_v42 = vsel %vm2232_vm12, %v780_v36, %v784_v16  ;;  %v868_v56 = vrot.slane %v866_v49, 5  ;;  %v941_v45 = vsel %vm2169_vm9, %v1754_v20, %v940_v21  ;;  %v650_v50 = vrot.slane %v604_v43, 5  ;;  %427 = vst.msk [vmem:[#allocation3 + $0x48] sm:$0xf] %vm178_vm0, %v419_v60  ;;  %428 = vst.msk [vmem:[#allocation3 + $0x54] sm:$0xf] %vm178_vm0, %v420_v0 }
  0x78   : > { %1165 = vrot.lane.b32.xlu1 %v1102_v23, %s2031_s11  ;;  %879 = vst.msk [vmem:[#allocation3 + $0x10] sm:$0xf] %vm178_vm0, %v785_v42  ;;  %v855_v55 = vsel %vm2232_vm12, %v850_v29, %v854_v22  ;;  %v863_v58 = vor.u32 %v862_v53, %v859_v47  ;;  %v647_v3 = vsel %vm2169_vm9, %v1745_v41, %v646_v11  ;;  %v987_v20 = vld [vmem:[#allocation2 + $0x30] sm:$0xf]  ;;  %v416_v59 = vld [vmem:[#allocation2 + $0x18] sm:$0xf] }
  0x79   : > { %884 = vst.msk [vmem:[#allocation3 + $0x4c] sm:$0xf] %vm178_vm0, %v855_v55  ;;  %v1124_v21 = vor.u32 %v2463_v40, %v2433_v44  ;;  %v415_v57 = vld [vmem:[#allocation2 + $0x10] sm:$0xf]  ;;  %v746_v4 = vld [vmem:[#allocation2 + $0x18] sm:$0xf]  ;;  %v651_v41 = vsel %vm2169_vm9, %v1746_v54, %v650_v50 }
  0x7a   : > { %568 = vrot.lane.b32.xlu0 %v517_v28, %s2032_s17  ;;  %v864_v61 = vrot.slane %v863_v58, 4  ;;  %423 = vst.msk [vmem:[#allocation3 + $0x18] sm:$0xf] %vm178_vm0, %v415_v57  ;;  %424 = vst.msk [vmem:[#allocation3 + $0x24] sm:$0xf] %vm178_vm0, %v416_v59  ;;  %v787_v48 = vshrl.u32 %v746_v4, 16 }
  0x7b   : > { %v747_v30 = vld [vmem:[#allocation2 + $0x1c] sm:$0x1]  ;;  %v790_v11 = vshll.u32 %v746_v4, 16  ;;  %v748_v2 = vld [vmem:[#allocation2 + $0x20] sm:$0xf]  ;;  %v2525_v44 = vrot.slane %v1113_v31, 5 }
  0x7c   : > { %570 = vrot.lane.b32.xlu1 %v531_v38, %s2032_s17  ;;  %v869_v12 = vsel %vm2232_vm12, %v864_v61, %v868_v56  ;;  %v796_v40 = vshll.u32 %v747_v30, 16  ;;  %v749_v6 = vld [vmem:[#allocation2 + $0x24] sm:$0x1]  ;;  %v801_v8 = vshrl.u32 %v748_v2, 16  ;;  %v804_v9 = vshll.u32 %v748_v2, 16 }
  0x7d   : > { %885 = vst.msk [vmem:[#allocation3 + $0x58] sm:$0xf] %vm178_vm0, %v869_v12  ;;  %v988_v7 = vld [vmem:[#allocation2 + $0x38] sm:$0xf]  ;;  %v1111_v14 = vrot.slane %v1110_v10, 4  ;;  %v789_v13 = vrot.slane %v787_v48, 4 }
  0x7e   : > { %958 = vrot.lane.b32.xlu0 %v937_v1, %s2032_s17  ;;  %v792_v5 = vrot.slane %v790_v11, 5  ;;  %v810_v15 = vshll.u32 %v749_v6, 16  ;;  %v697_v16 = vld [vmem:[#allocation2 + $0x28] sm:$0xf]  ;;  %v2528_v18 = vrot.slane %v1124_v21, 4  ;;  %v2532_v19 = vrot.slane %v1127_v51, 5 }
  0x7f   : > { %v803_v17 = vrot.slane %v801_v8, 4  ;;  %v806_v31 = vrot.slane %v804_v9, 5  ;;  %v798_v24 = vrot.slane %v796_v40, 5  ;;  %v1191_v22 = vld [vmem:[#allocation2 + $0x10] sm:$0xe]  ;;  %v1116_v27 = vsel %vm2232_vm12, %v1111_v14, %v2525_v44 }
  0x80   : > { %960 = vrot.lane.b32.xlu1 %v941_v45, %s2032_s17  ;;  %v793_v23 = vor.u32 %v792_v5, %v789_v13  ;;  %v812_v25 = vrot.slane %v810_v15, 5  ;;  %v1192_v28 = vld [vmem:[#allocation2 + $0x14] sm:$0x1]  ;;  %v1193_v32 = vld [vmem:[#allocation2 + $0x18] sm:$0xe]  ;;  %v1757_v36 = vrot.slane %v1191_v22, 9  ;;  %v1130_v59 = vsel %vm2232_vm12, %v2528_v18, %v2532_v19 }
  0x81   : > { %v807_v26 = vor.u32 %v806_v31, %v803_v17  ;;  %v698_v33 = vld [vmem:[#allocation2 + $0x30] sm:$0xf]  ;;  %v1194_v35 = vld [vmem:[#allocation2 + $0x1c] sm:$0x1]  ;;  %v1225_v37 = vrot.slane %v1192_v28, 5  ;;  %v1758_v39 = vrot.slane %v1193_v32, 9 }
  0x82   : > { %668 = vrot.lane.b32.xlu0 %v647_v3, %s2030_s6  ;;  %v794_v34 = vrot.slane %v793_v23, 4  ;;  %v1229_v43 = vrot.slane %v1194_v35, 5  ;;  %v1195_v29 = vld [vmem:[#allocation2 + $0x20] sm:$0xe]  ;;  %v1196_v49 = vld [vmem:[#allocation2 + $0x24] sm:$0x1] }
  0x83   : > { %v808_v51 = vrot.slane %v807_v26, 4  ;;  %v1226_v38 = vsel %vm2169_vm9, %v1757_v36, %v1225_v37  ;;  %v1197_v42 = vld [vmem:[#allocation2 + $0x28] sm:$0xe]  ;;  %v1198_v47 = vld [vmem:[#allocation2 + $0x2c] sm:$0x1]  ;;  %v1759_v53 = vrot.slane %v1195_v29, 9 }
  0x84   : > { %670 = vrot.lane.b32.xlu1 %v651_v41, %s2030_s6  ;;  %v799_v52 = vsel %vm2232_vm12, %v794_v34, %v798_v24  ;;  %v1233_v1 = vrot.slane %v1196_v49, 5  ;;  %v1230_v55 = vsel %vm2169_vm9, %v1758_v39, %v1229_v43  ;;  %1263 = vst.msk [vmem:[#allocation3 + $0x8] sm:$0xf] %vm178_vm0, %v1226_v38  ;;  %v1760_v56 = vrot.slane %v1197_v42, 9  ;;  %v417_v60 = vld [vmem:[#allocation2 + $0x20] sm:$0xf] }
  0x85   : > { %880 = vst.msk [vmem:[#allocation3 + $0x1c] sm:$0xf] %vm178_vm0, %v799_v52  ;;  %v813_v54 = vsel %vm2232_vm12, %v808_v51, %v812_v25  ;;  %v1237_v58 = vrot.slane %v1198_v47, 5  ;;  %v1199_v45 = vld [vmem:[#allocation2 + $0x30] sm:$0xe]  ;;  %vm584_vm13 = vcmask 519424  }
  0x86   : > { %1007 = vrot.lane.b32.xlu0 %v987_v20, %s2030_s6  ;;  %881 = vst.msk [vmem:[#allocation3 + $0x28] sm:$0xf] %vm178_vm0, %v813_v54  ;;  %1264 = vst.msk [vmem:[#allocation3 + $0x14] sm:$0xf] %vm178_vm0, %v1230_v55  ;;  %v1234_v50 = vsel %vm2169_vm9, %v1759_v53, %v1233_v1  ;;  %v1200_v61 = vld [vmem:[#allocation2 + $0x34] sm:$0x1] }
  0x87   : > { %425 = vst.msk [vmem:[#allocation3 + $0x30] sm:$0xf] %vm178_vm0, %v417_v60  ;;  %v1201_v0 = vld [vmem:[#allocation2 + $0x38] sm:$0xe]  ;;  %v1202_v3 = vld [vmem:[#allocation2 + $0x3c] sm:$0x1]  ;;  %v1238_v10 = vsel %vm2169_vm9, %v1760_v56, %v1237_v58 }
  0x88   : > { %1009 = vrot.lane.b32.xlu1 %v988_v7, %s2030_s6  ;;  %1265 = vst.msk [vmem:[#allocation3 + $0x20] sm:$0xf] %vm178_vm0, %v1234_v50  ;;  %v1761_v12 = vrot.slane %v1199_v45, 9  ;;  %v1241_v20 = vrot.slane %v1200_v61, 5  ;;  %v1762_v21 = vrot.slane %v1201_v0, 9  ;;  %v1245_v4 = vrot.slane %v1202_v3, 5 }
  0x89   : > { %v418_v57 = vld [vmem:[#allocation2 + $0x28] sm:$0xf]  ;;  %1266 = vst.msk [vmem:[#allocation3 + $0x2c] sm:$0xf] %vm178_vm0, %v1238_v10  ;;  %v1203_v41 = vld [vmem:[#allocation2 + $0x40] sm:$0xe] }
  0x8a   : > { %717 = vrot.lane.b32.xlu0 %v697_v16, %s2031_s11  ;;  %426 = vst.msk [vmem:[#allocation3 + $0x3c] sm:$0xf] %vm178_vm0, %v418_v57  ;;  %v1204_v30 = vld [vmem:[#allocation2 + $0x44] sm:$0x1]  ;;  %v1242_v48 = vsel %vm2169_vm9, %v1761_v12, %v1241_v20  ;;  %v1205_v11 = vld [vmem:[#allocation2 + $0x48] sm:$0xe]  ;;  %v1246_v6 = vsel %vm2169_vm9, %v1762_v21, %v1245_v4 }
  0x8b   : > { %v1206_v2 = vld [vmem:[#allocation2 + $0x4c] sm:$0x1]  ;;  %v1763_v44 = vrot.slane %v1203_v41, 9  ;;  %v1249_v40 = vrot.slane %v1204_v30, 5  ;;  %1267 = vst.msk [vmem:[#allocation3 + $0x38] sm:$0xf] %vm178_vm0, %v1242_v48 }
  0x8c   : > { %719 = vrot.lane.b32.xlu1 %v698_v33, %s2031_s11  ;;  %v1764_v8 = vrot.slane %v1205_v11, 9  ;;  %v1253_v9 = vrot.slane %v1206_v2, 5  ;;  %v750_v7 = vld [vmem:[#allocation2 + $0x28] sm:$0xf]  ;;  %v751_v14 = vld [vmem:[#allocation2 + $0x2c] sm:$0x1] }
  0x8d   : > { %1268 = vst.msk [vmem:[#allocation3 + $0x44] sm:$0xf] %vm178_vm0, %v1246_v6  ;;  %v1250_v13 = vsel %vm2169_vm9, %v1763_v44, %v1249_v40  ;;  %v815_v5 = vshrl.u32 %v750_v7, 16  ;;  %v818_v15 = vshll.u32 %v750_v7, 16  ;;  %v824_v16 = vshll.u32 %v751_v14, 16  ;;  %v1957_v44 = vld [vmem:[%s2717_s1 + $0x80] sm:$0xff]  }
  0x8e   : > { %1167 = vrot.lane.b32.xlu0 %v1116_v27, %s2031_s11  ;;  %v752_v18 = vld [vmem:[#allocation2 + $0x30] sm:$0xf]  ;;  %v1254_v19 = vsel %vm2169_vm9, %v1764_v8, %v1253_v9  ;;  %1269 = vst.msk [vmem:[#allocation3 + $0x50] sm:$0xf] %vm178_vm0, %v1250_v13  ;;  %v753_v17 = vld [vmem:[#allocation2 + $0x34] sm:$0x1] }
  0x8f   : > { %v829_v31 = vshrl.u32 %v752_v18, 16  ;;  %v832_v23 = vshll.u32 %v752_v18, 16  ;;  %1270 = vst.msk [vmem:[#allocation3 + $0x5c] sm:$0xf] %vm178_vm0, %v1254_v19  ;;  %v817_v24 = vrot.slane %v815_v5, 4  ;;  %v820_v25 = vrot.slane %v818_v15, 5 }
  0x90   : > { %1169 = vrot.lane.b32.xlu1 %v1130_v59, %s2031_s11  ;;  %v838_v28 = vshll.u32 %v753_v17, 16  ;;  %v826_v33 = vrot.slane %v824_v16, 5  ;;  %vm684_vm14 = vcmask 781824   ;;  %vm733_vm15 = vcmask 1044224   ;;  %v1958_v41 = vld [vmem:[#allocation3 + $0x8] ss:$12 sps:$4 sm:$0xff]  }
  0x91   : > { %v831_v26 = vrot.slane %v829_v31, 4  ;;  %v834_v22 = vrot.slane %v832_v23, 5  ;;  %v821_v32 = vor.u32 %v820_v25, %v817_v24  ;;  %v1959_v8 = vld [vmem:[#allocation3 + $0x20] ss:$12 sps:$4 sm:$0xff]   ;;  %s161_s17 = sand.u32 1, %s2019_s13   ;;  %vm1641_vm1 = vcmask 523264  }
  0x92   : > { %v840_v35 = vrot.slane %v838_v28, 5  ;;  %s1730_s10 = sshll.u32 %s161_s17, 6  ;;  %s2676_s16 = scalar_lea.sflag [#allocation5], %s161_s17 }
  0x93   : > { %v835_v34 = vor.u32 %v834_v22, %v831_v26  ;;  %v822_v36 = vrot.slane %v821_v32, 4  ;;  %s2647_s19 = scalar_lea.vmem [#allocation4], %s1730_s10 }
  0x94   : > { %v1960_v7 = vld [vmem:[#allocation3 + $0x38] ss:$12 sps:$4 sm:$0xff]   ;;  %s1664_s24 = sshll.u32 %s2647_s19, 4  ;;  %s2670_s24 = int_to_ptr.vmem [resolvable:$true] %s1664_s24 }
  0x95   : > { %v836_v37 = vrot.slane %v835_v34, 4  ;;  %v827_v62 = vsel %vm2232_vm12, %v822_v36, %v826_v33  ;;  %s1967_s28 = scalar_lea.vmem %s2670_s24, 1024  ;;  %p1974_p0 = scmp.lt.s32.totalorder %s2670_s24, %s1972_s30 }
  0x96   : > { %882 = vst.msk [vmem:[#allocation3 + $0x34] sm:$0xf] %vm178_vm0, %v827_v62  ;;  %v1961_v5 = vld [vmem:[#allocation3 + $0x50] ss:$12 sps:$4 sm:$0xff]   ;;  %p1968_p11 = scmp.ne.s32.totalorder %s2670_s24, %s1967_s28  ;;  %p1975_p1 = scmp.lt.s32.totalorder %s1973_s4, %s1967_s28 }
  0x97   : > { %v841_v39 = vsel %vm2232_vm12, %v836_v37, %v840_v35 }
  0x98   : > { %883 = vst.msk [vmem:[#allocation3 + $0x40] sm:$0xf] %vm178_vm0, %v841_v39  ;;  %vm1498_vm0 = vcmask 261120   ;;  %p1969_p12 = pnand %p1968_p11, %p2094_p5  ;;  %p1976_p2 = por %p1975_p1, %p1974_p0 }
  0x9a   : > { %p1970_p13 = pneg %p1969_p12 }
  0x9c   : > { %p1977_p3 = pnand %p1976_p2, %p1970_p13 }
  0x9e   : > { %v661_v27 = vpop.permute.xlu0 %660 }
  0xa3   : > { %v1002_v51 = vpop.permute.xlu1 %1001 }
  0xa4   : > { %v1000_v43 = vpop.permute.xlu0 %999 }
  0xa7   : > { %v712_v29 = vpop.permute.xlu1 %711 }
  0xa8   : > { %v710_v49 = vpop.permute.xlu0 %709 }
  0xab   : > { %v951_v52 = vpop.permute.xlu1 %950 }
  0xac   : > { %v561_v38 = vpop.permute.xlu0 %560  ;;  %974 = vst.msk [vmem:[#allocation3 + $0x4] sm:$0xf] %vm584_vm13, %v951_v52 }
  0xad   : > { %585 = vst.msk [vmem:[#allocation3] sm:$0xf] %vm584_vm13, %v561_v38 }
  0xae   : > { %685 = vst.msk [vmem:[#allocation3] sm:$0xf] %vm684_vm14, %v661_v27  ;;  %1023 = vst.msk [vmem:[#allocation3 + $0x4] sm:$0xf] %vm684_vm14, %v1000_v43 }
  0xaf   : > { %734 = vst.msk [vmem:[#allocation3] sm:$0xf] %vm733_vm15, %v710_v49  ;;  %v953_v63 = vpop.permute.xlu1 %952 }
  0xb0   : > { %v963_v42 = vpop.permute.xlu0 %962  ;;  %975 = vst.msk [vmem:[#allocation3 + $0x10] sm:$0xf] %vm584_vm13, %v953_v63 }
  0xb1   : > { %980 = vst.msk [vmem:[#allocation3 + $0x4c] sm:$0xf] %vm584_vm13, %v963_v42  ;;  %v1765_v42 = vld [vmem:[%s2718_s2] ss:$0 sm:$0xff] }
  0xb2   : > { %1024 = vst.msk [vmem:[#allocation3 + $0x10] sm:$0xf] %vm684_vm14, %v1002_v51 }
  0xb4   : > { %v663_v47 = vpop.permute.xlu1 %662 }
  0xb8   : > { %v673_v53 = vpop.permute.xlu0 %672 }
  0xba   : > { %v965_v1 = vpop.permute.xlu1 %964 }
  0xbb   : > { %981 = vst.msk [vmem:[#allocation3 + $0x58] sm:$0xf] %vm584_vm13, %v965_v1 }
  0xbc   : > { %v563_v54 = vpop.permute.xlu0 %562 }
  0xbd   : > { %586 = vst.msk [vmem:[#allocation3 + $0xc] sm:$0xf] %vm584_vm13, %v563_v54 }
  0xbe   : > { %686 = vst.msk [vmem:[#allocation3 + $0xc] sm:$0xf] %vm684_vm14, %v663_v47  ;;  %v675_v55 = vpop.permute.xlu1 %674 }
  0xbf   : > { %735 = vst.msk [vmem:[#allocation3 + $0xc] sm:$0xf] %vm733_vm15, %v712_v29 }
  0xc0   : > { %v1160_v56 = vpop.permute.xlu0 %1159 }
  0xc1   : > { %1183 = vst.msk [vmem:[#allocation3 + $0x4] sm:$0xf] %vm733_vm15, %v1160_v56 }
  0xc2   : > { %v1162_v58 = vpop.permute.xlu1 %1161 }
  0xc3   : > { %1184 = vst.msk [vmem:[#allocation3 + $0x10] sm:$0xf] %vm733_vm15, %v1162_v58 }
  0xc4   : > { %v573_v60 = vpop.permute.xlu0 %572 }
  0xc5   : > { %591 = vst.msk [vmem:[#allocation3 + $0x48] sm:$0xf] %vm584_vm13, %v573_v60 }
  0xc6   : > { %691 = vst.msk [vmem:[#allocation3 + $0x48] sm:$0xf] %vm684_vm14, %v673_v53  ;;  %v575_v45 = vpop.permute.xlu1 %574  ;;  %v1950_v0 = vld [vmem:[#allocation3] ss:$12 sps:$4 sm:$0xff]  }
  0xc7   : > { %592 = vst.msk [vmem:[#allocation3 + $0x54] sm:$0xf] %vm584_vm13, %v575_v45 }
  0xc8   : > { %v1012_v50 = vpop.permute.xlu0 %1011  ;;  %692 = vst.msk [vmem:[#allocation3 + $0x54] sm:$0xf] %vm684_vm14, %v675_v55 }
  0xc9   : > { %1029 = vst.msk [vmem:[#allocation3 + $0x4c] sm:$0xf] %vm684_vm14, %v1012_v50 }
  0xca   : > { %v1014_v61 = vpop.permute.xlu1 %1013  ;;  %v1952_v3 = vld [vmem:[#allocation3 + $0x4] ss:$12 sps:$4 sm:$0xff]  }
  0xcb   : > { %1030 = vst.msk [vmem:[#allocation3 + $0x58] sm:$0xf] %vm684_vm14, %v1014_v61  ;;  %1543 = vmatprep.mubr.bf16.mxu0 %v1952_v3 }
  0xcc   : > { %v722_v10 = vpop.permute.xlu0 %721  ;;  %1544 = vmatmul.mubr.bf16.vlgmr.msra.gmra.mxu0 %v1950_v0 }
  0xcd   : > { %740 = vst.msk [vmem:[#allocation3 + $0x48] sm:$0xf] %vm733_vm15, %v722_v10 }
  0xce   : > { %v724_v12 = vpop.permute.xlu1 %723 }
  0xcf   : > { %741 = vst.msk [vmem:[#allocation3 + $0x54] sm:$0xf] %vm733_vm15, %v724_v12 }
  0xd0   : > { %v1172_v20 = vpop.permute.xlu0 %1171 }
  0xd1   : > { %1189 = vst.msk [vmem:[#allocation3 + $0x4c] sm:$0xf] %vm733_vm15, %v1172_v20 }
  0xd2   : > { %v1174_v21 = vpop.permute.xlu1 %1173 }
  0xd3   : > { %1190 = vst.msk [vmem:[#allocation3 + $0x58] sm:$0xf] %vm733_vm15, %v1174_v21 }
  0xd4   : > { %v565_v57 = vpop.permute.xlu0 %564 }
  0xd5   : > { %587 = vst.msk [vmem:[#allocation3 + $0x18] sm:$0xf] %vm584_vm13, %v565_v57 }
  0xd6   : > { %v567_v59 = vpop.permute.xlu1 %566  ;;  %v1953_v48 = vld [vmem:[#allocation3 + $0x48] ss:$12 sps:$4 sm:$0xff]  }
  0xd7   : > { %588 = vst.msk [vmem:[#allocation3 + $0x24] sm:$0xf] %vm584_vm13, %v567_v59 }
  0xd8   : > { %v955_v4 = vpop.permute.xlu0 %954 }
  0xd9   : > { %976 = vst.msk [vmem:[#allocation3 + $0x1c] sm:$0xf] %vm584_vm13, %v955_v4 }
  0xda   : > { %v957_v30 = vpop.permute.xlu1 %956  ;;  %v1955_v11 = vld [vmem:[#allocation3 + $0x4c] ss:$12 sps:$4 sm:$0xff]  }
  0xdb   : > { %977 = vst.msk [vmem:[#allocation3 + $0x28] sm:$0xf] %vm584_vm13, %v957_v30  ;;  %1567 = vmatprep.mubr.bf16.mxu1 %v1955_v11 }
  0xdc   : > { %v665_v2 = vpop.permute.xlu0 %664  ;;  %1568 = vmatmul.mubr.bf16.vlgmr.msra.gmra.mxu1 %v1953_v48 }
  0xdd   : > { %687 = vst.msk [vmem:[#allocation3 + $0x18] sm:$0xf] %vm684_vm14, %v665_v2  ;;  %1862 = vmatpush3.bf16.msra.mxu1 %v2427_v46  ;;  %1865 = vmatprep.mubr.msk.bf16.mxu1 %vm1498_vm0, %v1958_v41 }
  0xde   : > { %v667_v40 = vpop.permute.xlu1 %666  ;;  %1863 = vmatprep.subr.bf16.mxu1 %v1957_v44 }
  0xdf   : > { %688 = vst.msk [vmem:[#allocation3 + $0x24] sm:$0xf] %vm684_vm14, %v667_v40 }
  0xe0   : > { %v1004_v6 = vpop.permute.xlu0 %1003 }
  0xe1   : > { %1025 = vst.msk [vmem:[#allocation3 + $0x1c] sm:$0xf] %vm684_vm14, %v1004_v6  ;;  %1864 = vmatpush3.bf16.msra.mxu1 %v1957_v44 }
  0xe2   : > { %v1006_v9 = vpop.permute.xlu1 %1005 }
  0xe3   : > { %1026 = vst.msk [vmem:[#allocation3 + $0x28] sm:$0xf] %vm684_vm14, %v1006_v9 }
  0xe4   : > { %v714_v14 = vpop.permute.xlu0 %713  ;;  %1866 = vmatmul.mubr.msk.bf16.vlgmr.msra.gmra.mxu1 %vm1498_vm0, %v1959_v8 }
  0xe5   : > { %736 = vst.msk [vmem:[#allocation3 + $0x18] sm:$0xf] %vm733_vm15, %v714_v14  ;;  %1869 = vmatprep.mubr.msk.bf16.mxu1 %vm1498_vm0, %v1960_v7 }
  0xe6   : > { %v716_v46 = vpop.permute.xlu1 %715 }
  0xe7   : > { %737 = vst.msk [vmem:[#allocation3 + $0x24] sm:$0xf] %vm733_vm15, %v716_v46 }
  0xe8   : > { %v1164_v13 = vpop.permute.xlu0 %1163 }
  0xe9   : > { %1185 = vst.msk [vmem:[#allocation3 + $0x1c] sm:$0xf] %vm733_vm15, %v1164_v13 }
  0xea   : > { %v1166_v15 = vpop.permute.xlu1 %1165 }
  0xeb   : > { %1186 = vst.msk [vmem:[#allocation3 + $0x28] sm:$0xf] %vm733_vm15, %v1166_v15 }
  0xec   : > { %v569_v16 = vpop.permute.xlu0 %568  ;;  %1870 = vmatmul.mubr.msk.bf16.gmra.mxu1 %vm1498_vm0, %v1961_v5 }
  0xed   : > { %589 = vst.msk [vmem:[#allocation3 + $0x30] sm:$0xf] %vm584_vm13, %v569_v16 }
  0xee   : > { %v571_v18 = vpop.permute.xlu1 %570 }
  0xef   : > { %590 = vst.msk [vmem:[#allocation3 + $0x3c] sm:$0xf] %vm584_vm13, %v571_v18 }
  0xf0   : > { %v959_v19 = vpop.permute.xlu0 %958  ;;  %v1275_v31 = vld [vmem:[#allocation3 + $0x18] sm:$0xff] }
  0xf1   : > { %978 = vst.msk [vmem:[#allocation3 + $0x34] sm:$0xf] %vm584_vm13, %v959_v19 }
  0xf2   : > { %v961_v17 = vpop.permute.xlu1 %960  ;;  %v1277_v23 = vld [vmem:[#allocation3 + $0x24] sm:$0xff] }
  0xf3   : > { %v1962_v24 = vld [vmem:[#allocation3 + $0x1c] ss:$12 sps:$4 sm:$0xff]   ;;  %979 = vst.msk [vmem:[#allocation3 + $0x40] sm:$0xf] %vm584_vm13, %v961_v17  ;;  %v1769_v26 = vcombine.low %v1275_v31, %v1277_v23 }
  0xf4   : > { %v669_v25 = vpop.permute.xlu0 %668  ;;  %1551 = vmatprep.mubr.bf16.mxu0 %v1962_v24 }
  0xf5   : > { %689 = vst.msk [vmem:[#allocation3 + $0x30] sm:$0xf] %vm684_vm14, %v669_v25  ;;  %1552 = vmatmul.mubr.bf16.gmra.mxu0 %v1769_v26 }
  0xf6   : > { %v671_v22 = vpop.permute.xlu1 %670 }
  0xf7   : > { %690 = vst.msk [vmem:[#allocation3 + $0x3c] sm:$0xf] %vm684_vm14, %v671_v22 }
  0xf8   : > { %v1008_v28 = vpop.permute.xlu0 %1007 }
  0xf9   : > { %1027 = vst.msk [vmem:[#allocation3 + $0x34] sm:$0xf] %vm684_vm14, %v1008_v28 }
  0xfa   : > { %v1010_v32 = vpop.permute.xlu1 %1009 }
  0xfb   : > { %1028 = vst.msk [vmem:[#allocation3 + $0x40] sm:$0xf] %vm684_vm14, %v1010_v32 }
  0xfc   : > { %v718_v33 = vpop.permute.xlu0 %717 }
  0xfd   : > { %738 = vst.msk [vmem:[#allocation3 + $0x30] sm:$0xf] %vm733_vm15, %v718_v33 }
  0xfe   : > { %v720_v34 = vpop.permute.xlu1 %719 }
  0xff   : > { %739 = vst.msk [vmem:[#allocation3 + $0x3c] sm:$0xf] %vm733_vm15, %v720_v34 }
 0x100   : > { %v1168_v35 = vpop.permute.xlu0 %1167 }
 0x101   : > { %1187 = vst.msk [vmem:[#allocation3 + $0x34] sm:$0xf] %vm733_vm15, %v1168_v35 }
 0x102   : > { %v1170_v36 = vpop.permute.xlu1 %1169 }
 0x103   : > { %1188 = vst.msk [vmem:[#allocation3 + $0x40] sm:$0xf] %vm733_vm15, %v1170_v36 }
 0x106   : > { %v1966_v62 = vld [vmem:[#allocation3 + $0x30] ss:$12 sps:$4 sm:$0xff]  }
 0x10a   : > { %v1964_v37 = vld [vmem:[#allocation3 + $0x34] ss:$12 sps:$4 sm:$0xff]  }
 0x10b   : > { %1559 = vmatprep.mubr.bf16.mxu0 %v1964_v37 }
 0x10c   : > { %1560 = vmatmul.mubr.bf16.gmra.mxu0 %v1966_v62 }
 0x18c   : > { %v1831_v39 = vpop.f32.mrf.mxu0 }
 0x18e   : > { %v1832_v27 = vpop.f32.mrf.mxu0 }
 0x18f   : > { %v1833_v52 = vadd.f32 %v1832_v27, %v1831_v39 }
 0x190   : > { %v1834_v43 = vpop.f32.mrf.mxu0 }
 0x191   : > { %v1546_v1 = vadd.f32 %v1833_v52, %v1765_v42 }
 0x192   : > { %v1835_v38 = vpop.f32.mrf.mxu0 }
 0x193   : > { %v1836_v53 = vadd.f32 %v1835_v38, %v1834_v43 }
 0x195   : > { %v1549_v60 = vadd.f32 %v1836_v53, %v1765_v42 }
 0x19c   : > { %v1849_v51 = vpop.f32.mrf.mxu1 }
 0x19e   : > { %v1850_v29 = vpop.f32.mrf.mxu1 }
 0x19f   : > { %v1851_v55 = vadd.f32 %v1850_v29, %v1849_v51 }
 0x1a0   : > { %v1852_v49 = vpop.f32.mrf.mxu1 }
 0x1a1   : > { %v1570_v0 = vadd.f32 %v1851_v55, %v1765_v42 }
 0x1a2   : > { %v1853_v63 = vpop.f32.mrf.mxu1 }
 0x1a3   : > { %v1854_v50 = vadd.f32 %v1853_v63, %v1852_v49 }
 0x1a4   : > { %v1867_v47 = vpop.f32.mrf.mxu1 }
 0x1a5   : > { %v1573_v20 = vadd.f32 %v1854_v50, %v1765_v42 }
 0x1a6   : > { %v1610_v54 = vpop.f32.mrf.mxu1 }
 0x1a7   : > { %v1611_v56 = vadd.f32 %v1610_v54, %v1546_v1 }
 0x1a8   : > { %v1868_v58 = vpop.f32.mrf.mxu1 }
 0x1a9   : > { %1642 = vst.msk [vmem:[%s2647_s19] sm:$0xff] %vm1641_vm1, %v1611_v56 }
 0x1aa   : > { %v1613_v45 = vpop.f32.mrf.mxu1 }
 0x1ab   : > { %v1614_v61 = vadd.f32 %v1613_v45, %v1549_v60 }
 0x1ac   : > { %v1871_v3 = vpop.f32.mrf.mxu1 }
 0x1ad   : > { %1643 = vst.msk [vmem:[%s2647_s19 + $0x8] sm:$0xff] %vm1641_vm1, %v1614_v61  ;;  %v1635_v10 = vadd.f32 %v1871_v3, %v1570_v0 }
 0x1ae   : > { %v1626_v12 = vpop.f32.mrf.mxu1 }
 0x1af   : > { %1648 = vst.msk [vmem:[%s2647_s19 + $0x30] sm:$0xff] %vm1641_vm1, %v1635_v10 }
 0x1b0   : > { %v1872_v21 = vpop.f32.mrf.mxu1 }
 0x1b1   : > { %v1638_v57 = vadd.f32 %v1872_v21, %v1573_v20 }
 0x1b2   : > { %v1629_v18 = vpop.f32.mrf.mxu1 }
 0x1b3   : > { %1649 = vst.msk [vmem:[%s2647_s19 + $0x38] sm:$0xff] %vm1641_vm1, %v1638_v57 }
 0x1b5   : > { %v1837_v59 = vpop.f32.mrf.mxu0 }
 0x1b7   : > { %v1838_v4 = vpop.f32.mrf.mxu0 }
 0x1b8   : > { %v1839_v41 = vadd.f32 %v1838_v4, %v1837_v59 }
 0x1b9   : > { %v1840_v30 = vpop.f32.mrf.mxu0 }
 0x1ba   : > { %v1554_v48 = vadd.f32 %v1839_v41, %v1765_v42 }
 0x1bb   : > { %v1841_v11 = vpop.f32.mrf.mxu0 }
 0x1bc   : > { %v1619_v2 = vadd.f32 %v1867_v47, %v1554_v48  ;;  %v1842_v44 = vadd.f32 %v1841_v11, %v1840_v30 }
 0x1be   : > { %1644 = vst.msk [vmem:[%s2647_s19 + $0x10] sm:$0xff] %vm1641_vm1, %v1619_v2  ;;  %v1557_v40 = vadd.f32 %v1842_v44, %v1765_v42 }
 0x1c0   : > { %v1622_v6 = vadd.f32 %v1868_v58, %v1557_v40 }
 0x1c2   : > { %1645 = vst.msk [vmem:[%s2647_s19 + $0x18] sm:$0xff] %vm1641_vm1, %v1622_v6 }
 0x1cc   : > { %v1843_v8 = vpop.f32.mrf.mxu0 }
 0x1ce   : > { %v1844_v9 = vpop.f32.mrf.mxu0 }
 0x1cf   : > { %v1845_v7 = vadd.f32 %v1844_v9, %v1843_v8 }
 0x1d0   : > { %v1846_v14 = vpop.f32.mrf.mxu0 }
 0x1d1   : > { %v1562_v46 = vadd.f32 %v1845_v7, %v1765_v42 }
 0x1d2   : > { %v1847_v13 = vpop.f32.mrf.mxu0 }
 0x1d3   : > { %v1627_v5 = vadd.f32 %v1626_v12, %v1562_v46  ;;  %v1848_v15 = vadd.f32 %v1847_v13, %v1846_v14 }
 0x1d5   : > { %1646 = vst.msk [vmem:[%s2647_s19 + $0x20] sm:$0xff] %vm1641_vm1, %v1627_v5  ;;  %v1565_v16 = vadd.f32 %v1848_v15, %v1765_v42 }
 0x1d7   : > { %v1630_v19 = vadd.f32 %v1629_v18, %v1565_v16 }
 0x1d9   : > { %1647 = vst.msk [vmem:[%s2647_s19 + $0x28] sm:$0xff] %vm1641_vm1, %v1630_v19 }
 0x1da   : > { %1980 = shalt.err (!%p1977_p3)
}
 0x1db   : > { %s1981_s5 = scalar_lea.hbm %s2668_s27, 1024  ;;  %s1985_s11 = scalar_lea.hbm %s2719_s3, 2048 }
 0x1dc   : > { %p1982_p4 = scmp.ne.s32.totalorder %s2668_s27, %s1981_s5  ;;  %p1986_p9 = scmp.lt.s32.totalorder %s2668_s27, %s2719_s3 }
 0x1dd   : > { %p1987_p10 = scmp.lt.s32.totalorder %s1985_s11, %s1981_s5 }
 0x1de   : > { %p1983_p7 = pnand %p1982_p4, %p2094_p5 }
 0x1df   : > { %p1988_p11 = por %p1987_p10, %p1986_p9 }
 0x1e0   : > { %p1984_p8 = pneg %p1983_p7 }
 0x1e2   : > { %p1989_p12 = pnand %p1988_p11, %p1984_p8 }
 0x1e4   : > { %1992 = shalt.err (!%p1989_p12)
}
 0x1e5   : > { %s2034_s9 = smov 128   ;;  %s2035_s10 = smov 8  }
 0x1e6   : > { %1889 = dma.vmem_to_hbm [thread:$0]  (%p2094_p5), %s2670_s24, 1024, %s2668_s27, %s2676_s16, %s2034_s9, %s2034_s9, %s2035_s10  }
 0x1e7 PF: > { %p1895_p13 = scmp.ge.s32.totalorder %s2027_s15, 2  ;;  %s1679_s19 = sand.u32 1, %s2015_s12  }
 0x1e8   : > { %s1680_s20 = scalar_lea.sflag [#allocation5], %s1679_s19 }
 0x1e9   : > { %p1892_p0 = pnand %p1895_p13, %p2098_p6 }
 0x1eb   : > { %p1893_p1 = pneg %p1892_p0 }
 0x1ed   : > { %2010 = dma.done.wait (%p1893_p1), %s1680_s20, 1024  }
 0x1ee   : > { %2012 = vsyncadd (%p1893_p1), %s1680_s20, 4294966272  ;;  %p13_p2 = scmp.ge.s32.totalorder %s2081_s18, 4   ;;  %s2732_s12 = smov %s2019_s13 }
 0x1ef   : > { %s2733_s13 = smov %s2023_s14  ;;  %s2734_s14 = smov %s2092_s21 }
 0x1f0   : > { %s2735_s15 = smov %s2081_s18  ;;  %15 = sbr.rel (!%p13_p2) target bundleno = 3 (0x3), region = 70 }
 0x1f5   :  { %1685 = vsyncpa [#allocation5], 1 }
 0x1f6   :  { %1687 = vsyncpa [#allocation5 + $0x1], 1 }

</bundles_post_ra>
